<compile_context>
chip_gen: v7x
topology: tpu7x:2x2x1
jax: 0.10.0
libtpu: 0.0.40
codegen_flags: <defaults>
</compile_context>

<pallas_src>
import functools

import jax
import jax.numpy as jnp
import numpy as np
from jax.experimental import pallas as pl
from jax.experimental.pallas import tpu as pltpu


def _round_up(x, m):
    return ((x + m - 1) // m) * m


def _chip_caps():
    """(tm_cap, tn_cap, tk_cap, vmem_limit_bytes) tuned per TPU generation."""
    kind = ""
    try:
        kind = jax.devices()[0].device_kind.lower()
    except Exception:
        pass
    if "v5 lite" in kind or "v5e" in kind:
        # v5e roofline ~240 flop/byte: 256x256 output tiles already balanced.
        return 256, 256, 512, 32 * 1024 * 1024
    if "v7" in kind:
        # v7x: only 64 MiB VMEM/TC -> keep scoped limit <= ~48 MiB.
        return 512, 512, 1024, 48 * 1024 * 1024
    # v6e and default: bigger tiles to reach the ~650 flop/byte roofline.
    return 512, 512, 1024, 64 * 1024 * 1024


def _largest_divisor_tile(dim_p, cap):
    """Largest multiple of 128 that divides dim_p (a multiple of 128), <= cap."""
    best, t = 128, 128
    while t <= min(cap, dim_p):
        if dim_p % t == 0:
            best = t
        t += 128
    return best


# ----------------------------------------------------------------------------
# Kernel 1: tiled matmul (im2col path for strided conv1), fused bias+ReLU
# ----------------------------------------------------------------------------
def _mm_kernel(x_ref, w_ref, b_ref, o_ref, acc_ref, *, relu):
    k = pl.program_id(2)

    @pl.when(k == 0)
    def _():
        acc_ref[...] = jnp.zeros_like(acc_ref)

    acc_ref[...] += jnp.dot(x_ref[...], w_ref[...],
                            preferred_element_type=jnp.float32)

    @pl.when(k == pl.num_programs(2) - 1)
    def _():
        res = acc_ref[...] + b_ref[...]
        if relu:
            res = jnp.maximum(res, 0.0)
        o_ref[...] = res.astype(o_ref.dtype)


def _conv_matmul(patches, w_packed, bias_packed, *, relu, out_dtype):
    """(M,K) bf16 patches @ pre-packed (Kp,Coutp) bf16 weight, fused bias/ReLU.

    Returns the (Mp, Coutp) padded result; caller slices rows.
    """
    M, K = patches.shape
    Kp, Coutp = w_packed.shape
    cap_m, cap_n, cap_k, vmem = _chip_caps()

    tm = min(cap_m, _round_up(M, 16))          # bf16 sublane pack
    Mp = _round_up(M, tm)
    tk = _largest_divisor_tile(Kp, cap_k)      # Kp already a multiple of 128
    tn = _largest_divisor_tile(Coutp, cap_n)

    x = jnp.pad(patches.astype(jnp.bfloat16), ((0, Mp - M), (0, Kp - K)))

    grid = (Mp // tm, Coutp // tn, Kp // tk)
    flops = 2 * Mp * Kp * Coutp
    out_bytes = 2 if out_dtype == jnp.bfloat16 else 4
    bytes_accessed = int(x.size * 2 * (Coutp // tn)
                         + w_packed.size * 2 * (Mp // tm)
                         + bias_packed.size * 4 + Mp * Coutp * out_bytes)

    return pl.pallas_call(
        functools.partial(_mm_kernel, relu=relu),
        out_shape=jax.ShapeDtypeStruct((Mp, Coutp), out_dtype),
        grid_spec=pltpu.PrefetchScalarGridSpec(
            num_scalar_prefetch=0,
            grid=grid,
            in_specs=[
                pl.BlockSpec((tm, tk), lambda i, j, k: (i, k)),
                pl.BlockSpec((tk, tn), lambda i, j, k: (k, j)),
                pl.BlockSpec((1, tn), lambda i, j, k: (0, j)),
            ],
            out_specs=pl.BlockSpec((tm, tn), lambda i, j, k: (i, j)),
            scratch_shapes=[pltpu.VMEM((tm, tn), jnp.float32)],
        ),
        compiler_params=pltpu.CompilerParams(
            dimension_semantics=("parallel", "parallel", "arbitrary"),
            vmem_limit_bytes=vmem),
        cost_estimate=pl.CostEstimate(flops=flops, transcendentals=0,
                                      bytes_accessed=bytes_accessed),
    )(x, w_packed, bias_packed)


# ----------------------------------------------------------------------------
# Kernel 2: direct 3x3 stride-1 conv, no im2col.
#   Padded image rows are flattened; tap (dy,dx) is the length H*WP window at
#   static offset dy*WP+dx of the flattened slab -> one MXU dot per tap.
#   Optional fused 1x1 shortcut (extra input + weight) and/or identity
#   residual and ReLU are applied in the same kernel.
# ----------------------------------------------------------------------------
def _direct_conv_kernel(*refs, WP, H, relu, has_residual, has_shortcut):
    x_ref, w_ref, b_ref = refs[0], refs[1], refs[2]
    idx = 3
    xs_ref = ws_ref = r_ref = None
    if has_shortcut:
        xs_ref, ws_ref = refs[idx], refs[idx + 1]
        idx += 2
    if has_residual:
        r_ref = refs[idx]
        idx += 1
    o_ref = refs[idx]

    M = H * WP
    x = x_ref[0]                                    # (HP*WP, Cinp) bf16
    acc = jnp.zeros((M, o_ref.shape[-1]), jnp.float32)
    for t in range(9):                              # statically unrolled taps
        dy, dx = divmod(t, 3)
        off = dy * WP + dx
        acc = acc + jnp.dot(x[off:off + M, :], w_ref[t],
                            preferred_element_type=jnp.float32)
    if has_shortcut:                                # fused 1x1 downsample path
        acc = acc + jnp.dot(xs_ref[0], ws_ref[...],
                            preferred_element_type=jnp.float32)
    acc = acc + b_ref[...]
    if has_residual:                                # identity shortcut
        acc = acc + r_ref[0].astype(jnp.float32)
    if relu:
        acc = jnp.maximum(acc, 0.0)
    o_ref[0] = acc.astype(o_ref.dtype)


def _direct_conv3x3(x, w9, bias, *, relu, residual=None, shortcut=None,
                    out_dtype=jnp.float32):
    """3x3 / stride 1 / pad 1 conv.  x: (N,H,W,Cin).  Returns (N,H,W,Coutp)."""
    # TODO(synk): row-tile with a halo index_map (or manual halo DMA) instead of
    # one whole-image block per grid step once H*W*Cin outgrows VMEM.
    N, H, W, Cin = x.shape
    _, Cinp, Coutp = w9.shape
    HP, WP = H + 3, W + 2        # top pad 1, bottom pad 2 (flat-window overrun)
    M = H * WP

    xp = jnp.pad(x.astype(jnp.bfloat16),
                 ((0, 0), (1, 2), (1, 1), (0, Cinp - Cin))
                 ).reshape(N, HP * WP, Cinp)

    _, cap_n, _, vmem = _chip_caps()
    tn = _largest_divisor_tile(Coutp, cap_n)

    inputs = [xp, w9, bias]
    in_specs = [
        pl.BlockSpec((1, HP * WP, Cinp), lambda n, j: (n, 0, 0)),
        pl.BlockSpec((9, Cinp, tn), lambda n, j: (0, 0, j)),
        pl.BlockSpec((1, tn), lambda n, j: (0, j)),
    ]

    has_shortcut = shortcut is not None
    has_residual = residual is not None
    flops = 2 * N * M * Cinp * Coutp * 9

    if has_shortcut:
        xs, ws = shortcut
        Cs = xs.shape[-1]
        Csp = ws.shape[0]
        xsp = jnp.pad(xs.astype(jnp.bfloat16),
                      ((0, 0), (0, 0), (0, WP - W), (0, Csp - Cs))
                      ).reshape(N, M, Csp)
        inputs += [xsp, ws]
        in_specs += [pl.BlockSpec((1, M, Csp), lambda n, j: (n, 0, 0)),
                     pl.BlockSpec((Csp, tn), lambda n, j: (0, j))]
        flops += 2 * N * M * Csp * Coutp

    if has_residual:
        Cr = residual.shape[-1]
        rp = jnp.pad(residual.astype(jnp.bfloat16),
                     ((0, 0), (0, 0), (0, WP - W), (0, Coutp - Cr))
                     ).reshape(N, M, Coutp)
        inputs.append(rp)
        in_specs.append(pl.BlockSpec((1, M, tn), lambda n, j: (n, 0, j)))

    out_bytes = 2 if out_dtype == jnp.bfloat16 else 4
    bytes_accessed = int(xp.size * 2 + w9.size * 2 + bias.size * 4
                         + N * M * Coutp * out_bytes)

    out = pl.pallas_call(
        functools.partial(_direct_conv_kernel, WP=WP, H=H, relu=relu,
                          has_residual=has_residual, has_shortcut=has_shortcut),
        out_shape=jax.ShapeDtypeStruct((N, M, Coutp), out_dtype),
        grid_spec=pltpu.PrefetchScalarGridSpec(
            num_scalar_prefetch=0,
            grid=(N, Coutp // tn),
            in_specs=in_specs,
            out_specs=pl.BlockSpec((1, M, tn), lambda n, j: (n, 0, j)),
            scratch_shapes=[],
        ),
        compiler_params=pltpu.CompilerParams(
            dimension_semantics=("parallel", "parallel"),
            vmem_limit_bytes=vmem),
        cost_estimate=pl.CostEstimate(flops=flops, transcendentals=0,
                                      bytes_accessed=bytes_accessed),
    )(*inputs)

    # Drop the junk right-pad columns; keep channel padding (lane-dense).
    return out.reshape(N, H, WP, Coutp)[:, :, :W, :]


# ----------------------------------------------------------------------------
# Weight pre-packing (done once, outside the forward pass)
# ----------------------------------------------------------------------------
def _pack_conv3x3(w_oihw):
    cout, cin, kh, kw = w_oihw.shape
    w = jnp.transpose(w_oihw, (2, 3, 1, 0)).reshape(kh * kw, cin, cout)
    cinp, coutp = _round_up(cin, 128), _round_up(cout, 128)
    return jnp.pad(w, ((0, 0), (0, cinp - cin), (0, coutp - cout))
                   ).astype(jnp.bfloat16)


def _pack_matmul_weight(w_oihw):
    cout, cin, kh, kw = w_oihw.shape
    w = jnp.transpose(w_oihw, (2, 3, 1, 0)).reshape(kh * kw * cin, cout)
    kp, coutp = _round_up(w.shape[0], 128), _round_up(cout, 128)
    return jnp.pad(w, ((0, kp - w.shape[0]), (0, coutp - cout))
                   ).astype(jnp.bfloat16)


def _pack_bias(b):
    coutp = _round_up(b.shape[0], 128)
    return jnp.pad(b.astype(jnp.float32), (0, coutp - b.shape[0])
                   ).reshape(1, coutp)


def pack_params(params, stride):
    packed = {}
    if stride == 1:
        packed["w1"] = _pack_conv3x3(params["w1"])          # direct conv1
    else:
        packed["w1"] = _pack_matmul_weight(params["w1"])    # im2col conv1
    packed["b1"] = _pack_bias(params["b1"])
    packed["w2"] = _pack_conv3x3(params["w2"])
    b2 = params["b2"]
    if "ws" in params:
        packed["ws"] = _pack_matmul_weight(params["ws"])    # 1x1 -> (Cinp,Coutp)
        b2 = b2 + params["bs"]                              # fused into conv2
    packed["b2"] = _pack_bias(b2)
    return packed


# ----------------------------------------------------------------------------
# im2col glue (only used for strided conv1)
# ----------------------------------------------------------------------------
def _im2col(x_nhwc, kh, kw, stride, pad):
    N, H, W, C = x_nhwc.shape
    xp = jnp.pad(x_nhwc, ((0, 0), (pad, pad), (pad, pad), (0, 0)))
    Ho = (H + 2 * pad - kh) // stride + 1
    Wo = (W + 2 * pad - kw) // stride + 1
    cols = []
    for i in range(kh):
        for j in range(kw):
            cols.append(xp[:, i:i + stride * Ho:stride,
                           j:j + stride * Wo:stride, :])
    patches = jnp.concatenate(cols, axis=-1)        # (N, Ho, Wo, kh*kw*C) bf16
    return patches.reshape(N * Ho * Wo, kh * kw * C), Ho, Wo


# ----------------------------------------------------------------------------
# BasicBlock forward
# ----------------------------------------------------------------------------
def basic_block_forward(x_nchw, packed, *, stride, planes):
    x = jnp.transpose(x_nchw, (0, 2, 3, 1)).astype(jnp.bfloat16)   # NHWC bf16
    N = x.shape[0]

    # conv1 (3x3, stride, pad 1) + bias + ReLU, bf16 output
    if stride == 1:
        out1 = _direct_conv3x3(x, packed["w1"], packed["b1"], relu=True,
                               out_dtype=jnp.bfloat16)
    else:
        # TODO(synk): replace the strided-conv im2col with an in-kernel
        # space-to-depth / halo-DMA formulation to avoid the 9x patch copy.
        p1, Ho, Wo = _im2col(x, 3, 3, stride, 1)
        M = p1.shape[0]
        o = _conv_matmul(p1, packed["w1"], packed["b1"], relu=True,
                         out_dtype=jnp.bfloat16)
        out1 = o[:M].reshape(N, Ho, Wo, -1)

    # conv2 (3x3, stride 1, pad 1) + bias + shortcut-add + ReLU, ONE kernel
    if "ws" in packed:
        xs = x[:, ::stride, ::stride, :]      # 1x1/stride shortcut input
        out = _direct_conv3x3(out1, packed["w2"], packed["b2"], relu=True,
                              shortcut=(xs, packed["ws"]),
                              out_dtype=jnp.float32)
    else:
        out = _direct_conv3x3(out1, packed["w2"], packed["b2"], relu=True,
                              residual=x, out_dtype=jnp.float32)

    out = out[..., :planes]
    return jnp.transpose(out, (0, 3, 1, 2))          # NHWC -> NCHW


# ----------------------------------------------------------------------------
# Pure-JAX f32 reference (correctness check only)
# ----------------------------------------------------------------------------
def _ref_conv(x_nchw, w_oihw, b, stride, pad):
    dn = jax.lax.conv_dimension_numbers(x_nchw.shape, w_oihw.shape,
                                        ("NCHW", "OIHW", "NCHW"))
    y = jax.lax.conv_general_dilated(
        x_nchw, w_oihw, window_strides=(stride, stride),
        padding=[(pad, pad), (pad, pad)], dimension_numbers=dn)
    return y + b.reshape(1, -1, 1, 1)


def _ref_basic_block(x, params, stride):
    out = jax.nn.relu(_ref_conv(x, params["w1"], params["b1"], stride, 1))
    out = _ref_conv(out, params["w2"], params["b2"], 1, 1)
    if "ws" in params:
        short = _ref_conv(x, params["ws"], params["bs"], stride, 0)
    else:
        short = x
    return jax.nn.relu(out + short)


def make_params(key, in_planes, planes, stride):
    ks = jax.random.split(key, 6)
    params = {
        "w1": 0.1 * jax.random.normal(ks[0], (planes, in_planes, 3, 3), jnp.float32),
        "b1": 0.1 * jax.random.normal(ks[1], (planes,), jnp.float32),
        "w2": 0.1 * jax.random.normal(ks[2], (planes, planes, 3, 3), jnp.float32),
        "b2": 0.1 * jax.random.normal(ks[3], (planes,), jnp.float32),
    }
    if stride != 1 or in_planes != planes:
        params["ws"] = 0.1 * jax.random.normal(ks[4], (planes, in_planes, 1, 1), jnp.float32)
        params["bs"] = 0.1 * jax.random.normal(ks[5], (planes,), jnp.float32)
    return params


if __name__ == "__main__":
    key = jax.random.PRNGKey(0)

    configs = [
        # (N, in_planes, planes, H, W, stride)
        (2, 4, 8, 16, 16, 2),   # downsample block: fused 1x1/stride-2 shortcut
        (2, 8, 8, 16, 16, 1),   # identity block: direct conv1 + residual add
    ]
    for idx, (N, in_planes, planes, H, W, stride) in enumerate(configs):
        k_x, k_p = jax.random.split(jax.random.fold_in(key, idx))
        x = jax.random.normal(k_x, (N, in_planes, H, W), jnp.float32)
        params = make_params(k_p, in_planes, planes, stride)
        packed = pack_params(params, stride)

        fwd = jax.jit(functools.partial(basic_block_forward,
                                        stride=stride, planes=planes))
        out = jax.block_until_ready(fwd(x, packed))
        ref = jax.block_until_ready(_ref_basic_block(x, params, stride))

        Ho = (H - 1) // stride + 1
        Wo = (W - 1) // stride + 1
        assert out.shape == ref.shape == (N, planes, Ho, Wo)
        # bf16 MXU operands / bf16 intermediates vs f32 reference
        np.testing.assert_allclose(np.asarray(out), np.asarray(ref),
                                   rtol=2e-2, atol=2e-2)

    print("KERNEL_OK")
</pallas_src>

<mosaic_0001>
module attributes {stable_mosaic.version = 11 : i64} {
  func.func @_mm_kernel(%arg0: i32, %arg1: i32, %arg2: i32, %arg3: memref<128x128xbf16, #tpu.memory_space<vmem>>, %arg4: memref<128x128xbf16, #tpu.memory_space<vmem>>, %arg5: memref<1x128xf32, #tpu.memory_space<vmem>>, %arg6: memref<128x128xbf16, #tpu.memory_space<vmem>>, %arg7: memref<128x128xf32, #tpu.memory_space<vmem>>) attributes {dimension_semantics = [#tpu.dimension_semantics<parallel>, #tpu.dimension_semantics<parallel>, #tpu.dimension_semantics<arbitrary>], iteration_bounds = array<i64: 1, 1, 1>, scalar_prefetch = 0 : i64, scratch_operands = 1 : i64, tpu.core_type = #tpu.core_type<tc>, window_params = [{transform_indices = @transform_0, window_bounds = array<i64: 128, 128>}, {transform_indices = @transform_1, window_bounds = array<i64: 128, 128>}, {transform_indices = @transform_2, window_bounds = array<i64: 1, 128>}, {transform_indices = @transform_3, window_bounds = array<i64: 128, 128>}]} {
    %c0_i32 = arith.constant 0 : i32
    %0 = arith.cmpi eq, %arg2, %c0_i32 : i32
    %1 = arith.extui %0 : i1 to i32
    %c0_i32_0 = arith.constant 0 : i32
    %2 = arith.cmpi ne, %1, %c0_i32_0 : i32
    scf.if %2 {
      %cst_10 = arith.constant 0.000000e+00 : f32
      %12 = vector.broadcast %cst_10 : f32 to vector<128x128xf32>
      %c0_11 = arith.constant 0 : index
      %c0_12 = arith.constant 0 : index
      %13 = vector.load %arg7[%c0_11, %c0_12] : memref<128x128xf32, #tpu.memory_space<vmem>>, vector<128x128xf32>
      tpu.vector_store %arg7[%c0_11, %c0_12], %12 {strides = array<i32>} : memref<128x128xf32, #tpu.memory_space<vmem>>, vector<128x128xf32>,
    } else {
    }
    %c0 = arith.constant 0 : index
    %c0_1 = arith.constant 0 : index
    %3 = vector.load %arg7[%c0, %c0_1] : memref<128x128xf32, #tpu.memory_space<vmem>>, vector<128x128xf32>
    %c0_2 = arith.constant 0 : index
    %c0_3 = arith.constant 0 : index
    %4 = vector.load %arg3[%c0_2, %c0_3] : memref<128x128xbf16, #tpu.memory_space<vmem>>, vector<128x128xbf16>
    %c0_4 = arith.constant 0 : index
    %c0_5 = arith.constant 0 : index
    %5 = vector.load %arg4[%c0_4, %c0_5] : memref<128x128xbf16, #tpu.memory_space<vmem>>, vector<128x128xbf16>
    %cst = arith.constant dense<0.000000e+00> : vector<128x128xf32>
    %6 = tpu.matmul %4, %5, %cst {dimension_numbers = #tpu.dot_dimension_numbers<[1], [0], [0], [1], [0, 0, 1, 1], [], []>} : vector<128x128xbf16>, vector<128x128xbf16>, vector<128x128xf32> -> vector<128x128xf32>
    %7 = arith.addf %3, %6 : vector<128x128xf32>
    %c0_6 = arith.constant 0 : index
    %c0_7 = arith.constant 0 : index
    %8 = vector.load %arg7[%c0_6, %c0_7] : memref<128x128xf32, #tpu.memory_space<vmem>>, vector<128x128xf32>
    tpu.vector_store %arg7[%c0_6, %c0_7], %7 {strides = array<i32>} : memref<128x128xf32, #tpu.memory_space<vmem>>, vector<128x128xf32>,
    %c0_i32_8 = arith.constant 0 : i32
    %9 = arith.cmpi eq, %arg2, %c0_i32_8 : i32
    %10 = arith.extui %9 : i1 to i32
    %c0_i32_9 = arith.constant 0 : i32
    %11 = arith.cmpi ne, %10, %c0_i32_9 : i32
    scf.if %11 {
      %c0_10 = arith.constant 0 : index
      %c0_11 = arith.constant 0 : index
      %12 = vector.load %arg7[%c0_10, %c0_11] : memref<128x128xf32, #tpu.memory_space<vmem>>, vector<128x128xf32>
      %c0_12 = arith.constant 0 : index
      %c0_13 = arith.constant 0 : index
      %13 = vector.load %arg5[%c0_12, %c0_13] : memref<1x128xf32, #tpu.memory_space<vmem>>, vector<1x128xf32>
      %14 = vector.broadcast %13 : vector<1x128xf32> to vector<128x128xf32>
      %15 = arith.addf %12, %14 : vector<128x128xf32>
      %cst_14 = arith.constant 0.000000e+00 : f32
      %16 = vector.broadcast %cst_14 : f32 to vector<128x128xf32>
      %17 = arith.maximumf %15, %16 : vector<128x128xf32>
      %18 = arith.truncf %17 : vector<128x128xf32> to vector<128x128xbf16>
      %c0_15 = arith.constant 0 : index
      %c0_16 = arith.constant 0 : index
      %19 = vector.load %arg6[%c0_15, %c0_16] : memref<128x128xbf16, #tpu.memory_space<vmem>>, vector<128x128xbf16>
      tpu.vector_store %arg6[%c0_15, %c0_16], %18 {strides = array<i32>} : memref<128x128xbf16, #tpu.memory_space<vmem>>, vector<128x128xbf16>,
    } else {
    }
    return
  }
  func.func @transform_0(%arg0: i32, %arg1: i32, %arg2: i32) -> (i32, i32) {
    %c0_i32 = arith.constant 0 : i32
    return %arg0, %arg2 : i32, i32
  }
  func.func @transform_1(%arg0: i32, %arg1: i32, %arg2: i32) -> (i32, i32) {
    %c0_i32 = arith.constant 0 : i32
    return %arg2, %arg1 : i32, i32
  }
  func.func @transform_2(%arg0: i32, %arg1: i32, %arg2: i32) -> (i32, i32) {
    %c0_i32 = arith.constant 0 : i32
    %c0_i32_0 = arith.constant 0 : i32
    return %c0_i32, %arg1 : i32, i32
  }
  func.func @transform_3(%arg0: i32, %arg1: i32, %arg2: i32) -> (i32, i32) {
    %c0_i32 = arith.constant 0 : i32
    return %arg0, %arg1 : i32, i32
  }
}

module attributes {stable_mosaic.version = 11 : i64} {
  func.func @_direct_conv_kernel(%arg0: i32, %arg1: i32, %arg2: memref<1x110x128xbf16, #tpu.memory_space<vmem>>, %arg3: memref<9x128x128xbf16, #tpu.memory_space<vmem>>, %arg4: memref<1x128xf32, #tpu.memory_space<vmem>>, %arg5: memref<1x80x128xbf16, #tpu.memory_space<vmem>>, %arg6: memref<128x128xbf16, #tpu.memory_space<vmem>>, %arg7: memref<1x80x128xf32, #tpu.memory_space<vmem>>) attributes {dimension_semantics = [#tpu.dimension_semantics<parallel>, #tpu.dimension_semantics<parallel>], iteration_bounds = array<i64: 2, 1>, scalar_prefetch = 0 : i64, scratch_operands = 0 : i64, tpu.core_type = #tpu.core_type<tc>, window_params = [{transform_indices = @transform_0, window_bounds = array<i64: 1, 110, 128>}, {transform_indices = @transform_1, window_bounds = array<i64: 9, 128, 128>}, {transform_indices = @transform_2, window_bounds = array<i64: 1, 128>}, {transform_indices = @transform_3, window_bounds = array<i64: 1, 80, 128>}, {transform_indices = @transform_4, window_bounds = array<i64: 128, 128>}, {transform_indices = @transform_5, window_bounds = array<i64: 1, 80, 128>}]} {
    %c0 = arith.constant 0 : index
    %c0_0 = arith.constant 0 : index
    %c0_1 = arith.constant 0 : index
    %0 = vector.load %arg2[%c0, %c0_0, %c0_1] : memref<1x110x128xbf16, #tpu.memory_space<vmem>>, vector<1x110x128xbf16>
    %1 = vector.shape_cast %0 : vector<1x110x128xbf16> to vector<110x128xbf16>
    %cst = arith.constant 0.000000e+00 : f32
    %2 = vector.broadcast %cst : f32 to vector<80x128xf32>
    %3 = vector.extract_strided_slice %1 {offsets = [0, 0], sizes = [80, 128], strides = [1, 1]} : vector<110x128xbf16> to vector<80x128xbf16>
    %c0_2 = arith.constant 0 : index
    %c0_3 = arith.constant 0 : index
    %c0_4 = arith.constant 0 : index
    %4 = vector.load %arg3[%c0_2, %c0_3, %c0_4] : memref<9x128x128xbf16, #tpu.memory_space<vmem>>, vector<1x128x128xbf16>
    %5 = vector.shape_cast %4 : vector<1x128x128xbf16> to vector<128x128xbf16>
    %cst_5 = arith.constant dense<0.000000e+00> : vector<80x128xf32>
    %6 = tpu.matmul %3, %5, %cst_5 {dimension_numbers = #tpu.dot_dimension_numbers<[1], [0], [0], [1], [0, 0, 1, 1], [], []>} : vector<80x128xbf16>, vector<128x128xbf16>, vector<80x128xf32> -> vector<80x128xf32>
    %7 = arith.addf %2, %6 : vector<80x128xf32>
    %8 = vector.extract_strided_slice %1 {offsets = [1, 0], sizes = [80, 128], strides = [1, 1]} : vector<110x128xbf16> to vector<80x128xbf16>
    %c1 = arith.constant 1 : index
    %c0_6 = arith.constant 0 : index
    %c0_7 = arith.constant 0 : index
    %9 = vector.load %arg3[%c1, %c0_6, %c0_7] : memref<9x128x128xbf16, #tpu.memory_space<vmem>>, vector<1x128x128xbf16>
    %10 = vector.shape_cast %9 : vector<1x128x128xbf16> to vector<128x128xbf16>
    %cst_8 = arith.constant dense<0.000000e+00> : vector<80x128xf32>
    %11 = tpu.matmul %8, %10, %cst_8 {dimension_numbers = #tpu.dot_dimension_numbers<[1], [0], [0], [1], [0, 0, 1, 1], [], []>} : vector<80x128xbf16>, vector<128x128xbf16>, vector<80x128xf32> -> vector<80x128xf32>
    %12 = arith.addf %7, %11 : vector<80x128xf32>
    %13 = vector.extract_strided_slice %1 {offsets = [2, 0], sizes = [80, 128], strides = [1, 1]} : vector<110x128xbf16> to vector<80x128xbf16>
    %c2 = arith.constant 2 : index
    %c0_9 = arith.constant 0 : index
    %c0_10 = arith.constant 0 : index
    %14 = vector.load %arg3[%c2, %c0_9, %c0_10] : memref<9x128x128xbf16, #tpu.memory_space<vmem>>, vector<1x128x128xbf16>
    %15 = vector.shape_cast %14 : vector<1x128x128xbf16> to vector<128x128xbf16>
    %cst_11 = arith.constant dense<0.000000e+00> : vector<80x128xf32>
    %16 = tpu.matmul %13, %15, %cst_11 {dimension_numbers = #tpu.dot_dimension_numbers<[1], [0], [0], [1], [0, 0, 1, 1], [], []>} : vector<80x128xbf16>, vector<128x128xbf16>, vector<80x128xf32> -> vector<80x128xf32>
    %17 = arith.addf %12, %16 : vector<80x128xf32>
    %18 = vector.extract_strided_slice %1 {offsets = [10, 0], sizes = [80, 128], strides = [1, 1]} : vector<110x128xbf16> to vector<80x128xbf16>
    %c3 = arith.constant 3 : index
    %c0_12 = arith.constant 0 : index
    %c0_13 = arith.constant 0 : index
    %19 = vector.load %arg3[%c3, %c0_12, %c0_13] : memref<9x128x128xbf16, #tpu.memory_space<vmem>>, vector<1x128x128xbf16>
    %20 = vector.shape_cast %19 : vector<1x128x128xbf16> to vector<128x128xbf16>
    %cst_14 = arith.constant dense<0.000000e+00> : vector<80x128xf32>
    %21 = tpu.matmul %18, %20, %cst_14 {dimension_numbers = #tpu.dot_dimension_numbers<[1], [0], [0], [1], [0, 0, 1, 1], [], []>} : vector<80x128xbf16>, vector<128x128xbf16>, vector<80x128xf32> -> vector<80x128xf32>
    %22 = arith.addf %17, %21 : vector<80x128xf32>
    %23 = vector.extract_strided_slice %1 {offsets = [11, 0], sizes = [80, 128], strides = [1, 1]} : vector<110x128xbf16> to vector<80x128xbf16>
    %c4 = arith.constant 4 : index
    %c0_15 = arith.constant 0 : index
    %c0_16 = arith.constant 0 : index
    %24 = vector.load %arg3[%c4, %c0_15, %c0_16] : memref<9x128x128xbf16, #tpu.memory_space<vmem>>, vector<1x128x128xbf16>
    %25 = vector.shape_cast %24 : vector<1x128x128xbf16> to vector<128x128xbf16>
    %cst_17 = arith.constant dense<0.000000e+00> : vector<80x128xf32>
    %26 = tpu.matmul %23, %25, %cst_17 {dimension_numbers = #tpu.dot_dimension_numbers<[1], [0], [0], [1], [0, 0, 1, 1], [], []>} : vector<80x128xbf16>, vector<128x128xbf16>, vector<80x128xf32> -> vector<80x128xf32>
    %27 = arith.addf %22, %26 : vector<80x128xf32>
    %28 = vector.extract_strided_slice %1 {offsets = [12, 0], sizes = [80, 128], strides = [1, 1]} : vector<110x128xbf16> to vector<80x128xbf16>
    %c5 = arith.constant 5 : index
    %c0_18 = arith.constant 0 : index
    %c0_19 = arith.constant 0 : index
    %29 = vector.load %arg3[%c5, %c0_18, %c0_19] : memref<9x128x128xbf16, #tpu.memory_space<vmem>>, vector<1x128x128xbf16>
    %30 = vector.shape_cast %29 : vector<1x128x128xbf16> to vector<128x128xbf16>
    %cst_20 = arith.constant dense<0.000000e+00> : vector<80x128xf32>
    %31 = tpu.matmul %28, %30, %cst_20 {dimension_numbers = #tpu.dot_dimension_numbers<[1], [0], [0], [1], [0, 0, 1, 1], [], []>} : vector<80x128xbf16>, vector<128x128xbf16>, vector<80x128xf32> -> vector<80x128xf32>
    %32 = arith.addf %27, %31 : vector<80x128xf32>
    %33 = vector.extract_strided_slice %1 {offsets = [20, 0], sizes = [80, 128], strides = [1, 1]} : vector<110x128xbf16> to vector<80x128xbf16>
    %c6 = arith.constant 6 : index
    %c0_21 = arith.constant 0 : index
    %c0_22 = arith.constant 0 : index
    %34 = vector.load %arg3[%c6, %c0_21, %c0_22] : memref<9x128x128xbf16, #tpu.memory_space<vmem>>, vector<1x128x128xbf16>
    %35 = vector.shape_cast %34 : vector<1x128x128xbf16> to vector<128x128xbf16>
    %cst_23 = arith.constant dense<0.000000e+00> : vector<80x128xf32>
    %36 = tpu.matmul %33, %35, %cst_23 {dimension_numbers = #tpu.dot_dimension_numbers<[1], [0], [0], [1], [0, 0, 1, 1], [], []>} : vector<80x128xbf16>, vector<128x128xbf16>, vector<80x128xf32> -> vector<80x128xf32>
    %37 = arith.addf %32, %36 : vector<80x128xf32>
    %38 = vector.extract_strided_slice %1 {offsets = [21, 0], sizes = [80, 128], strides = [1, 1]} : vector<110x128xbf16> to vector<80x128xbf16>
    %c7 = arith.constant 7 : index
    %c0_24 = arith.constant 0 : index
    %c0_25 = arith.constant 0 : index
    %39 = vector.load %arg3[%c7, %c0_24, %c0_25] : memref<9x128x128xbf16, #tpu.memory_space<vmem>>, vector<1x128x128xbf16>
    %40 = vector.shape_cast %39 : vector<1x128x128xbf16> to vector<128x128xbf16>
    %cst_26 = arith.constant dense<0.000000e+00> : vector<80x128xf32>
    %41 = tpu.matmul %38, %40, %cst_26 {dimension_numbers = #tpu.dot_dimension_numbers<[1], [0], [0], [1], [0, 0, 1, 1], [], []>} : vector<80x128xbf16>, vector<128x128xbf16>, vector<80x128xf32> -> vector<80x128xf32>
    %42 = arith.addf %37, %41 : vector<80x128xf32>
    %43 = vector.extract_strided_slice %1 {offsets = [22, 0], sizes = [80, 128], strides = [1, 1]} : vector<110x128xbf16> to vector<80x128xbf16>
    %c8 = arith.constant 8 : index
    %c0_27 = arith.constant 0 : index
    %c0_28 = arith.constant 0 : index
    %44 = vector.load %arg3[%c8, %c0_27, %c0_28] : memref<9x128x128xbf16, #tpu.memory_space<vmem>>, vector<1x128x128xbf16>
    %45 = vector.shape_cast %44 : vector<1x128x128xbf16> to vector<128x128xbf16>
    %cst_29 = arith.constant dense<0.000000e+00> : vector<80x128xf32>
    %46 = tpu.matmul %43, %45, %cst_29 {dimension_numbers = #tpu.dot_dimension_numbers<[1], [0], [0], [1], [0, 0, 1, 1], [], []>} : vector<80x128xbf16>, vector<128x128xbf16>, vector<80x128xf32> -> vector<80x128xf32>
    %47 = arith.addf %42, %46 : vector<80x128xf32>
    %c0_30 = arith.constant 0 : index
    %c0_31 = arith.constant 0 : index
    %c0_32 = arith.constant 0 : index
    %48 = vector.load %arg5[%c0_30, %c0_31, %c0_32] : memref<1x80x128xbf16, #tpu.memory_space<vmem>>, vector<1x80x128xbf16>
    %49 = vector.shape_cast %48 : vector<1x80x128xbf16> to vector<80x128xbf16>
    %c0_33 = arith.constant 0 : index
    %c0_34 = arith.constant 0 : index
    %50 = vector.load %arg6[%c0_33, %c0_34] : memref<128x128xbf16, #tpu.memory_space<vmem>>, vector<128x128xbf16>
    %cst_35 = arith.constant dense<0.000000e+00> : vector<80x128xf32>
    %51 = tpu.matmul %49, %50, %cst_35 {dimension_numbers = #tpu.dot_dimension_numbers<[1], [0], [0], [1], [0, 0, 1, 1], [], []>} : vector<80x128xbf16>, vector<128x128xbf16>, vector<80x128xf32> -> vector<80x128xf32>
    %52 = arith.addf %47, %51 : vector<80x128xf32>
    %c0_36 = arith.constant 0 : index
    %c0_37 = arith.constant 0 : index
    %53 = vector.load %arg4[%c0_36, %c0_37] : memref<1x128xf32, #tpu.memory_space<vmem>>, vector<1x128xf32>
    %54 = vector.broadcast %53 : vector<1x128xf32> to vector<80x128xf32>
    %55 = arith.addf %52, %54 : vector<80x128xf32>
    %cst_38 = arith.constant 0.000000e+00 : f32
    %56 = vector.broadcast %cst_38 : f32 to vector<80x128xf32>
    %57 = arith.maximumf %55, %56 : vector<80x128xf32>
    %c0_39 = arith.constant 0 : index
    %c0_40 = arith.constant 0 : index
    %c0_41 = arith.constant 0 : index
    %58 = vector.load %arg7[%c0_39, %c0_40, %c0_41] : memref<1x80x128xf32, #tpu.memory_space<vmem>>, vector<1x80x128xf32>
    %59 = vector.shape_cast %58 : vector<1x80x128xf32> to vector<80x128xf32>
    %60 = vector.shape_cast %57 : vector<80x128xf32> to vector<1x80x128xf32>
    tpu.vector_store %arg7[%c0_39, %c0_40, %c0_41], %60 {strides = array<i32>} : memref<1x80x128xf32, #tpu.memory_space<vmem>>, vector<1x80x128xf32>,
    return
  }
  func.func @transform_0(%arg0: i32, %arg1: i32) -> (i32, i32, i32) {
    %c0_i32 = arith.constant 0 : i32
    %c0_i32_0 = arith.constant 0 : i32
    %c0_i32_1 = arith.constant 0 : i32
    return %arg0, %c0_i32, %c0_i32_0 : i32, i32, i32
  }
  func.func @transform_1(%arg0: i32, %arg1: i32) -> (i32, i32, i32) {
    %c0_i32 = arith.constant 0 : i32
    %c0_i32_0 = arith.constant 0 : i32
    %c0_i32_1 = arith.constant 0 : i32
    return %c0_i32, %c0_i32_0, %arg1 : i32, i32, i32
  }
  func.func @transform_2(%arg0: i32, %arg1: i32) -> (i32, i32) {
    %c0_i32 = arith.constant 0 : i32
    %c0_i32_0 = arith.constant 0 : i32
    return %c0_i32, %arg1 : i32, i32
  }
  func.func @transform_3(%arg0: i32, %arg1: i32) -> (i32, i32, i32) {
    %c0_i32 = arith.constant 0 : i32
    %c0_i32_0 = arith.constant 0 : i32
    %c0_i32_1 = arith.constant 0 : i32
    return %arg0, %c0_i32, %c0_i32_0 : i32, i32, i32
  }
  func.func @transform_4(%arg0: i32, %arg1: i32) -> (i32, i32) {
    %c0_i32 = arith.constant 0 : i32
    %c0_i32_0 = arith.constant 0 : i32
    return %c0_i32, %arg1 : i32, i32
  }
  func.func @transform_5(%arg0: i32, %arg1: i32) -> (i32, i32, i32) {
    %c0_i32 = arith.constant 0 : i32
    %c0_i32_0 = arith.constant 0 : i32
    return %arg0, %c0_i32, %arg1 : i32, i32, i32
  }
}

</mosaic_0001>

<bundles_post_ra>
// kernel: basic_block_forward.2
= control target key start
LH: loop header
LB: loop body
LE: loop exit
PB: predicated region body
PF: predicated region fallthrough
CT: control target
= control target key end

     0   :  { %8 = vsyncpa [#allocation4], 0  ;;  %s870_s0 = inlined_call_operand.hbm [shape: bf16[128,128], index: 0, kind: input, shape index: {}]   ;;  %s871_s1 = inlined_call_operand.hbm [shape: bf16[128,128], index: 1, kind: input, shape index: {}]   ;;  %s872_s2 = inlined_call_operand.hbm [shape: f32[1,128], index: 2, kind: input, shape index: {}]   ;;  %s873_s3 = inlined_call_operand.hbm [shape: bf16[128,128], index: 3, kind: output, shape index: {}]  }
   0x1   :  { %9 = vsyncpa [#allocation7], 0 }
   0x2   :  { %10 = vsyncpa [#allocation5], 0  ;;  %s780_s12 = smov [#allocation6]   ;;  %s781_s14 = smov [#allocation3]  }
   0x3   :  { %s28_s13 = sshll.u32 %s780_s12, 4  ;;  %s16_s15 = sshll.u32 %s781_s14, 4  ;;  %s29_s13 = int_to_ptr.vmem [resolvable:$true] %s28_s13  ;;  %s806_s15 = int_to_ptr.vmem [resolvable:$true] %s16_s15 }
   0x4   :  { %s686_s18 = scalar_lea.hbm %s871_s1, 1024 }
   0x5   :  { %p687_p0 = scmp.ne.s32.totalorder %s871_s1, %s686_s18  ;;  %p690_p1 = scmp.lt.u32.totalorder %s686_s18, %s871_s1 }
   0x7   :  { %p692_p2 = pnand %p690_p1, %p687_p0 }
   0x9   :  { %695 = shalt.err (!%p692_p2)
}
   0xa   :  { %s696_s23 = scalar_lea.vmem %s29_s13, 1024  ;;  %p701_p4 = scmp.lt.s32.totalorder %s29_s13, %s29_s13 }
   0xb   :  { %p697_p3 = scmp.ne.s32.totalorder %s29_s13, %s696_s23  ;;  %p702_p5 = scmp.lt.s32.totalorder %s696_s23, %s696_s23 }
   0xd   :  { %p703_p6 = por %p702_p5, %p701_p4 }
   0xf   :  { %p704_p7 = pnand %p703_p6, %p697_p3 }
  0x11   :  { %707 = shalt.err (!%p704_p7)
}
  0x12   :  { %s782_s24 = smov 64   ;;  %s783_s25 = smov 4  }
  0x13   :  { %34 = dma.hbm_to_vmem [thread:$0]  %s871_s1, 1024, %s29_s13, [#allocation7], %s782_s24, %s782_s24, %s783_s25  }
  0x14   :  { %s708_s30 = scalar_lea.hbm %s870_s0, 1024 }
  0x15   :  { %p709_p8 = scmp.ne.s32.totalorder %s870_s0, %s708_s30  ;;  %p712_p9 = scmp.lt.u32.totalorder %s708_s30, %s870_s0 }
  0x17   :  { %p714_p10 = pnand %p712_p9, %p709_p8 }
  0x19   :  { %717 = shalt.err (!%p714_p10)
}
  0x1a   :  { %s718_s8 = scalar_lea.vmem %s806_s15, 1024  ;;  %p723_p12 = scmp.lt.s32.totalorder %s806_s15, %s806_s15 }
  0x1b   :  { %p719_p11 = scmp.ne.s32.totalorder %s806_s15, %s718_s8  ;;  %p724_p13 = scmp.lt.s32.totalorder %s718_s8, %s718_s8 }
  0x1d   :  { %p725_p0 = por %p724_p13, %p723_p12 }
  0x1f   :  { %p726_p1 = pnand %p725_p0, %p719_p11 }
  0x21   :  { %729 = shalt.err (!%p726_p1)
}
  0x22   :  { %22 = dma.hbm_to_vmem [thread:$0]  %s870_s0, 1024, %s806_s15, [#allocation4], %s782_s24, %s782_s24, %s783_s25  }
  0x23   :  { %s784_s10 = smov [#allocation8]   ;;  %s730_s14 = scalar_lea.hbm %s872_s2, 16 }
  0x24   :  { %s41_s11 = sshll.u32 %s784_s10, 4  ;;  %p731_p2 = scmp.ne.s32.totalorder %s872_s2, %s730_s14  ;;  %s42_s11 = int_to_ptr.vmem [resolvable:$true] %s41_s11 }
  0x25   :  { %p734_p3 = scmp.lt.u32.totalorder %s730_s14, %s872_s2 }
  0x27   :  { %p736_p4 = pnand %p734_p3, %p731_p2 }
  0x29   :  { %739 = shalt.err (!%p736_p4)
}
  0x2a   :  { %s740_s20 = scalar_lea.vmem %s42_s11, 16  ;;  %s744_s0 = scalar_lea.vmem %s42_s11, 32 }
  0x2b   :  { %p741_p5 = scmp.ne.s32.totalorder %s42_s11, %s740_s20  ;;  %p745_p6 = scmp.lt.s32.totalorder %s42_s11, %s42_s11 }
  0x2c   :  { %p746_p7 = scmp.lt.s32.totalorder %s744_s0, %s740_s20 }
  0x2e   :  { %p747_p8 = por %p746_p7, %p745_p6 }
  0x30   :  { %p748_p9 = pnand %p747_p8, %p741_p5 }
  0x32   :  { %751 = shalt.err (!%p748_p9)
}
  0x33   :  { %44 = dma.hbm_to_vmem [thread:$0]  %s872_s2, 16, %s42_s11, [#allocation7]  }
  0x34   :  { %774 = dma.done.wait [#allocation4], 1024  }
  0x35   :  { %775 = vsyncadd [#allocation4], 4294966272 }
  0x36   :  { %776 = dma.done.wait [#allocation7], 1040  }
  0x37   :  { %777 = vsyncadd [#allocation7], 4294966256  ;;  %v670_v0 = vld [vmem:[#allocation6] sm:$0xff]   ;;  %v671_v1 = vld [vmem:[#allocation6 + $0x8] sm:$0xff]   ;;  %s785_s2 = smov [#allocation9]  }
  0x38   :  { %616 = vmatprep.subr.bf16.mxu0 %v670_v0  ;;  %648 = vmatprep.subr.bf16.mxu1 %v670_v0  ;;  %v672_v2 = vld [vmem:[#allocation6 + $0x10] sm:$0xff]   ;;  %v673_v3 = vld [vmem:[#allocation6 + $0x18] sm:$0xff]   ;;  %v678_v4 = vld [vmem:[#allocation3] sm:$0xff]   ;;  %s491_s22 = sshll.u32 %s785_s2, 4  ;;  %s492_s22 = int_to_ptr.vmem [resolvable:$true] %s491_s22 }
  0x39   :  { %617 = vmatpush3.bf16.msra.mxu0 %v670_v0  ;;  %656 = vmatpush3.bf16.msra.mxu1 %v670_v0  ;;  %v679_v5 = vld [vmem:[#allocation3 + $0x20] sm:$0xff]   ;;  %v675_v7 = vld [vmem:[#allocation6 + $0x28] sm:$0xff]   ;;  %v676_v8 = vld [vmem:[#allocation6 + $0x30] sm:$0xff]   ;;  %s752_s23 = scalar_lea.vmem %s492_s22, 1024  ;;  %p757_p11 = scmp.lt.s32.totalorder %s492_s22, %s492_s22 }
  0x3a   :  { %618 = vmatprep.subr.bf16.mxu0 %v671_v1  ;;  %649 = vmatprep.subr.bf16.mxu1 %v671_v1  ;;  %v674_v6 = vld [vmem:[#allocation6 + $0x20] sm:$0xff]   ;;  %v677_v9 = vld [vmem:[#allocation6 + $0x38] sm:$0xff]   ;;  %v680_v10 = vld [vmem:[#allocation3 + $0x8] sm:$0xff]   ;;  %p753_p10 = scmp.ne.s32.totalorder %s492_s22, %s752_s23  ;;  %p758_p12 = scmp.lt.s32.totalorder %s752_s23, %s752_s23 }
  0x3b   :  { %632 = vmatprep.mubr.bf16.mxu0 %v678_v4  ;;  %640 = vmatprep.mubr.bf16.mxu1 %v679_v5  ;;  %v681_v11 = vld [vmem:[#allocation3 + $0x28] sm:$0xff]   ;;  %v682_v12 = vld [vmem:[#allocation3 + $0x10] sm:$0xff]   ;;  %v684_v14 = vld [vmem:[#allocation3 + $0x18] sm:$0xff]  }
  0x3c   :  { %v683_v13 = vld [vmem:[#allocation3 + $0x30] sm:$0xff]   ;;  %v685_v15 = vld [vmem:[#allocation3 + $0x38] sm:$0xff]   ;;  %v520_v16 = vld [vmem:[#allocation8] ss:$0 sm:$0xff]  ;;  %p759_p13 = por %p758_p12, %p757_p11 }
  0x3d   :  { %619 = vmatpush3.bf16.msra.mxu0 %v671_v1  ;;  %657 = vmatpush3.bf16.msra.mxu1 %v671_v1 }
  0x3e   :  { %620 = vmatprep.subr.bf16.mxu0 %v672_v2  ;;  %650 = vmatprep.subr.bf16.mxu1 %v672_v2  ;;  %p760_p0 = pnand %p759_p13, %p753_p10 }
  0x41   :  { %621 = vmatpush3.bf16.msra.mxu0 %v672_v2  ;;  %658 = vmatpush3.bf16.msra.mxu1 %v672_v2 }
  0x42   :  { %622 = vmatprep.subr.bf16.mxu0 %v673_v3  ;;  %651 = vmatprep.subr.bf16.mxu1 %v673_v3 }
  0x45   :  { %623 = vmatpush3.bf16.msra.mxu0 %v673_v3  ;;  %659 = vmatpush3.bf16.msra.mxu1 %v673_v3 }
  0x46   :  { %624 = vmatprep.subr.bf16.mxu0 %v674_v6  ;;  %652 = vmatprep.subr.bf16.mxu1 %v674_v6 }
  0x49   :  { %625 = vmatpush3.bf16.msra.mxu0 %v674_v6  ;;  %660 = vmatpush3.bf16.msra.mxu1 %v674_v6 }
  0x4a   :  { %626 = vmatprep.subr.bf16.mxu0 %v675_v7  ;;  %653 = vmatprep.subr.bf16.mxu1 %v675_v7 }
  0x4d   :  { %627 = vmatpush3.bf16.msra.mxu0 %v675_v7  ;;  %661 = vmatpush3.bf16.msra.mxu1 %v675_v7 }
  0x4e   :  { %628 = vmatprep.subr.bf16.mxu0 %v676_v8  ;;  %654 = vmatprep.subr.bf16.mxu1 %v676_v8 }
  0x51   :  { %629 = vmatpush3.bf16.msra.mxu0 %v676_v8  ;;  %662 = vmatpush3.bf16.msra.mxu1 %v676_v8 }
  0x52   :  { %630 = vmatprep.subr.bf16.mxu0 %v677_v9  ;;  %655 = vmatprep.subr.bf16.mxu1 %v677_v9 }
  0x55   :  { %631 = vmatpush3.bf16.msra.mxu0 %v677_v9  ;;  %663 = vmatpush3.bf16.msra.mxu1 %v677_v9 }
  0x58   :  { %633 = vmatmul.mubr.bf16.vlgmr.msra.gmra.mrb[0].mxu0 %v680_v10  ;;  %641 = vmatmul.mubr.bf16.vlgmr.msra.gmra.mrb[0].mxu1 %v681_v11 }
  0x59   :  { %636 = vmatprep.mubr.bf16.mxu0 %v682_v12  ;;  %644 = vmatprep.mubr.bf16.mxu1 %v683_v13 }
  0x60   :  { %637 = vmatmul.mubr.bf16.gmra.mrb[4].mxu0 %v684_v14  ;;  %645 = vmatmul.mubr.bf16.gmra.mrb[4].mxu1 %v685_v15 }
 0x12b   :  { %v634_v17 = vpop.f32.mrb[0].mxu0  ;;  %v642_v18 = vpop.f32.mrb[0].mxu1 }
 0x12c   :  { %v376_v19 = vadd.f32 %v634_v17, %v520_v16  ;;  %v384_v20 = vadd.f32 %v642_v18, %v520_v16  ;;  %v253_v21 = vpop.f32.mrb[1].mxu0  ;;  %v285_v22 = vpop.f32.mrb[1].mxu1 }
 0x12d   :  { %v374_v23 = vadd.f32 %v520_v16, %v253_v21  ;;  %v382_v24 = vadd.f32 %v520_v16, %v285_v22  ;;  %v635_v25 = vpop.f32.mrb[2].mxu0  ;;  %v643_v26 = vpop.f32.mrb[2].mxu1 }
 0x12e   :  { %v377_v27 = vadd.f32 %v635_v25, %v520_v16  ;;  %v385_v28 = vadd.f32 %v643_v26, %v520_v16  ;;  %v256_v29 = vpop.f32.mrb[3].mxu0  ;;  %v288_v30 = vpop.f32.mrb[3].mxu1  ;;  %v392_v33 = vmax.f32 %v376_v19, 0.0  ;;  %v400_v34 = vmax.f32 %v384_v20, 0.0 }
 0x12f   :  { %v375_v31 = vadd.f32 %v520_v16, %v256_v29  ;;  %v383_v32 = vadd.f32 %v520_v16, %v288_v30  ;;  %v390_v37 = vmax.f32 %v374_v23, 0.0  ;;  %v398_v38 = vmax.f32 %v382_v24, 0.0 }
 0x130   :  { %v393_v35 = vmax.f32 %v377_v27, 0.0  ;;  %v401_v36 = vmax.f32 %v385_v28, 0.0 }
 0x131   :  { %v391_v39 = vmax.f32 %v375_v31, 0.0  ;;  %v399_v40 = vmax.f32 %v383_v32, 0.0 }
 0x132   :  { %v561_v41 = vpack.c.bf16 %v393_v35, %v392_v33  ;;  %v581_v42 = vpack.c.bf16 %v401_v36, %v400_v34 }
 0x133   :  { %v556_v43 = vpack.c.bf16 %v391_v39, %v390_v37  ;;  %v576_v44 = vpack.c.bf16 %v399_v40, %v398_v38  ;;  %v638_v45 = vpop.f32.mrb[4].mxu0  ;;  %v646_v46 = vpop.f32.mrb[4].mxu1 }
 0x134   :  { %593 = vst [vmem:[#allocation9 + $0x8] sm:$0xff] %v561_v41   ;;  %597 = vst [vmem:[#allocation9 + $0x28] sm:$0xff] %v581_v42   ;;  %v380_v47 = vadd.f32 %v638_v45, %v520_v16  ;;  %v388_v48 = vadd.f32 %v646_v46, %v520_v16  ;;  %v269_v49 = vpop.f32.mrb[5].mxu0  ;;  %v301_v50 = vpop.f32.mrb[5].mxu1 }
 0x135   :  { %557 = vst [vmem:[#allocation9] sm:$0xff] %v556_v43   ;;  %596 = vst [vmem:[#allocation9 + $0x20] sm:$0xff] %v576_v44   ;;  %v378_v51 = vadd.f32 %v520_v16, %v269_v49  ;;  %v386_v52 = vadd.f32 %v520_v16, %v301_v50  ;;  %v639_v53 = vpop.f32.mrb[6].mxu0  ;;  %v647_v54 = vpop.f32.mrb[6].mxu1 }
 0x136   :  { %v381_v55 = vadd.f32 %v639_v53, %v520_v16  ;;  %v389_v56 = vadd.f32 %v647_v54, %v520_v16  ;;  %v272_v57 = vpop.f32.mrb[7].mxu0  ;;  %v304_v58 = vpop.f32.mrb[7].mxu1  ;;  %v396_v61 = vmax.f32 %v380_v47, 0.0  ;;  %v404_v62 = vmax.f32 %v388_v48, 0.0 }
 0x137   :  { %v379_v59 = vadd.f32 %v520_v16, %v272_v57  ;;  %v387_v60 = vadd.f32 %v520_v16, %v304_v58  ;;  %v394_v1 = vmax.f32 %v378_v51, 0.0  ;;  %v402_v2 = vmax.f32 %v386_v52, 0.0 }
 0x138   :  { %v397_v63 = vmax.f32 %v381_v55, 0.0  ;;  %v405_v0 = vmax.f32 %v389_v56, 0.0 }
 0x139   :  { %v395_v3 = vmax.f32 %v379_v59, 0.0  ;;  %v403_v4 = vmax.f32 %v387_v60, 0.0 }
 0x13a   :  { %v571_v5 = vpack.c.bf16 %v397_v63, %v396_v61  ;;  %v591_v6 = vpack.c.bf16 %v405_v0, %v404_v62 }
 0x13b   :  { %v566_v7 = vpack.c.bf16 %v395_v3, %v394_v1  ;;  %v586_v8 = vpack.c.bf16 %v403_v4, %v402_v2 }
 0x13c   :  { %595 = vst [vmem:[#allocation9 + $0x18] sm:$0xff] %v571_v5   ;;  %599 = vst [vmem:[#allocation9 + $0x38] sm:$0xff] %v591_v6  }
 0x13d   :  { %594 = vst [vmem:[#allocation9 + $0x10] sm:$0xff] %v566_v7   ;;  %598 = vst [vmem:[#allocation9 + $0x30] sm:$0xff] %v586_v8  }
 0x13e   :  { %763 = shalt.err (!%p760_p0)
}
 0x13f   :  { %s764_s28 = scalar_lea.hbm %s873_s3, 1024 }
 0x140   :  { %p765_p1 = scmp.ne.s32.totalorder %s873_s3, %s764_s28  ;;  %p768_p2 = scmp.lt.u32.totalorder %s764_s28, %s873_s3 }
 0x142   :  { %p770_p3 = pnand %p768_p2, %p765_p1 }
 0x144   :  { %773 = shalt.err (!%p770_p3)
}
 0x145   :  { %497 = dma.vmem_to_hbm [thread:$0]  %s492_s22, 1024, %s873_s3, [#allocation5], %s782_s24, %s782_s24, %s783_s25  }
 0x146   :  { %778 = dma.done.wait [#allocation5], 1024  }
 0x147   :  { %779 = vsyncadd [#allocation5], 4294966272 }
 0x148   :  { %501 = vsyncpa [#allocation4], 1 }
 0x149   :  { %502 = vsyncpa [#allocation7], 1 }
 0x14a   :  { %503 = vsyncpa [#allocation5], 1 }

// kernel: basic_block_forward.3
= control target key start
LH: loop header
LB: loop body
LE: loop exit
PB: predicated region body
PF: predicated region fallthrough
CT: control target
= control target key end

     0   :  { %s4276_s0 = inlined_call_operand.hbm [shape: bf16[2,110,128], index: 0, kind: input, shape index: {}]   ;;  %s4277_s1 = inlined_call_operand.hbm [shape: bf16[9,128,128], index: 1, kind: input, shape index: {}]   ;;  %s4278_s2 = inlined_call_operand.hbm [shape: f32[1,128], index: 2, kind: input, shape index: {}]   ;;  %s4279_s3 = inlined_call_operand.hbm [shape: bf16[2,80,128], index: 3, kind: input, shape index: {}]   ;;  %s4280_s4 = inlined_call_operand.hbm [shape: bf16[128,128], index: 4, kind: input, shape index: {}]   ;;  %s4281_s5 = inlined_call_operand.hbm [shape: f32[2,80,128], index: 5, kind: output, shape index: {}]  }
   0x1   :  { %4290 = sst [smem:[#allocation18_spill]] %s4276_s0 }
   0x2   :  { %4291 = sst [smem:[#allocation19_spill]] %s4277_s1 }
   0x3   :  { %4292 = sst [smem:[#allocation20_spill]] %s4278_s2 }
   0x4   :  { %4293 = sst [smem:[#allocation21_spill]] %s4280_s4 }
   0x5   :  { %10 = vsyncpa [#allocation3], 0 }
   0x6   :  { %12 = vsyncpa [#allocation3 + $0x1], 0 }
   0x7   :  { %13 = vsyncpa [#allocation6], 0 }
   0x8   :  { %14 = vsyncpa [#allocation9], 0 }
   0x9   :  { %16 = vsyncpa [#allocation9 + $0x1], 0 }
   0xa   :  { %17 = vsyncpa [#allocation4], 0 }
   0xb   :  { %19 = vsyncpa [#allocation4 + $0x1], 0  ;;  %s3438_s18 = smov 0   ;;  %s3440_s19 = smov 0  }
   0xc   :  { %s3442_s20 = smov 0   ;;  %s3444_s21 = smov 0  }
   0xd   :  { %s3446_s22 = smov 0   ;;  %s3448_s23 = smov 0  }
   0xe LB: > { %s3469_s24 = sadd.s32 4294967295, %s3394_s23   ;;  %s2340_s25 = sadd.s32 4294967294, %s3394_s23   ;;  %s3394_s23 = sphi %s3448_s23, %s25_s23   ;;  %s3390_s22 = sphi %s3446_s22, %s4323_s22   ;;  %s3386_s21 = sphi %s3444_s21, %s4322_s21   ;;  %s3382_s20 = sphi %s3442_s20, %s4321_s20   ;;  %s3378_s19 = sphi %s3440_s19, %s4320_s19   ;;  %s3374_s18 = sphi %s3438_s18, %s4319_s18  }
   0xf   : > { %p57_p0 = scmp.ne.s32.totalorder %s3378_s19, %s3374_s18  ;;  %p4282_p1 = scmp.eq.s32.totalorder %s3469_s24, 0 }
  0x10   : > { %p193_p3 = scmp.eq.s32.totalorder %s2340_s25, 1  ;;  %p2341_p5 = scmp.ge.s32.totalorder %s3394_s23, 1 }
  0x11   : > { %p3478_p4 = por %p4282_p1, %p57_p0  ;;  %p200_p7 = scmp.lt.s32.totalorder %s3394_s23, 3 }
  0x12   : > { %p3483_p6 = por %p193_p3, %p57_p0  ;;  %s3396_s29 = smov [#allocation5]  }
  0x13   : > { %s4294_s26 = scalar_select %p3478_p4, 1, 0 }
  0x14   : > { %s4295_s27 = scalar_select %p3483_p6, 1, 0 }
  0x15   : > { %p3488_p8 = pnand %p2341_p5, %p200_p7  ;;  %s214_s30 = sshll.u32 %s3396_s29, 4  ;;  %s3492_s30 = int_to_ptr.vmem [resolvable:$true] %s214_s30 }
  0x16   : > { %4296 = sst [smem:[#allocation17_spill]] %s4295_s27  ;;  %s3397_s7 = smov [#allocation10]  }
  0x17   : > { %s4297_s28 = scalar_select %p3488_p8, 1, 0 }
  0x18   : > { %p2971_p9 = pneg %p3488_p8  ;;  %s242_s8 = sshll.u32 %s3397_s7, 4  ;;  %s3503_s8 = int_to_ptr.vmem [resolvable:$true] %s242_s8 }
  0x19   : > { %s3398_s9 = smov [#allocation7]   ;;  %s4299_s1 = sld [smem:[#allocation19_spill]] }
  0x1a   : > { %p3499_p11 = pnand %p2971_p9, %p4282_p1  ;;  %s3505_s10 = sshll.u32 %s3398_s9, 4  ;;  %s231_s10 = int_to_ptr.vmem [resolvable:$true] %s3505_s10 }
  0x1c   : > { %p3515_p13 = pneg %p3499_p11 }
  0x1f   : > { %s3156_s13 = scalar_lea.hbm %s4299_s1, 9216 }
  0x20   : > { %p3157_p12 = scmp.ne.s32.totalorder %s4299_s1, %s3156_s13  ;;  %p3163_p5 = scmp.lt.u32.totalorder %s3156_s13, %s4299_s1 }
  0x22   : > { %p3159_p0 = pnand %p3515_p13, %p3157_p12 }
  0x24   : > { %p3160_p3 = pneg %p3159_p0 }
  0x26   : > { %p3165_p7 = pnand %p3163_p5, %p3160_p3 }
  0x28   : > { %3168 = shalt.err (!%p3165_p7)
}
  0x29   : > { %s3169_s29 = scalar_lea.vmem %s3492_s30, 9216  ;;  %p3177_p2 = scmp.lt.s32.totalorder %s3492_s30, %s3492_s30 }
  0x2a   : > { %p3170_p9 = scmp.ne.s32.totalorder %s3492_s30, %s3169_s29  ;;  %p3178_p6 = scmp.lt.s32.totalorder %s3169_s29, %s3169_s29 }
  0x2c   : > { %p3172_p10 = pnand %p3170_p9, %p3515_p13  ;;  %p3179_p12 = por %p3178_p6, %p3177_p2 }
  0x2e   : > { %p3173_p1 = pneg %p3172_p10 }
  0x30   : > { %p3180_p0 = pnand %p3179_p12, %p3173_p1 }
  0x32   : > { %3183 = shalt.err (!%p3180_p0)
}
  0x33   : > { %s4286_s7 = smov 64   ;;  %s4288_s9 = smov 4  }
  0x34   : > { %2974 = dma.hbm_to_vmem [thread:$0]  (!%p3499_p11), %s4299_s1, 9216, %s3492_s30, [#allocation6], %s4286_s7, %s4286_s7, %s4288_s9  }
  0x35   : > { %s4301_s4 = sld [smem:[#allocation21_spill]] }
  0x3b   : > { %s3184_s15 = scalar_lea.hbm %s4301_s4, 1024 }
  0x3c   : > { %p3185_p1 = scmp.ne.s32.totalorder %s4301_s4, %s3184_s15  ;;  %p3191_p10 = scmp.lt.u32.totalorder %s3184_s15, %s4301_s4 }
  0x3e   : > { %p3187_p2 = pnand %p3185_p1, %p3515_p13 }
  0x40   : > { %p3188_p6 = pneg %p3187_p2 }
  0x42   : > { %p3193_p3 = pnand %p3191_p10, %p3188_p6 }
  0x44   : > { %3196 = shalt.err (!%p3193_p3)
}
  0x45   : > { %s3197_s30 = scalar_lea.vmem %s3503_s8, 1024  ;;  %p3205_p12 = scmp.lt.s32.totalorder %s3503_s8, %s3503_s8 }
  0x46   : > { %p3198_p5 = scmp.ne.s32.totalorder %s3503_s8, %s3197_s30  ;;  %p3206_p0 = scmp.lt.s32.totalorder %s3197_s30, %s3197_s30 }
  0x48   : > { %p3200_p7 = pnand %p3198_p5, %p3515_p13  ;;  %p3207_p1 = por %p3206_p0, %p3205_p12 }
  0x4a   : > { %p3201_p9 = pneg %p3200_p7 }
  0x4c   : > { %p3208_p2 = pnand %p3207_p1, %p3201_p9 }
  0x4e   : > { %3211 = shalt.err (!%p3208_p2)
}
  0x4f   : > { %2980 = dma.hbm_to_vmem [thread:$0]  (!%p3499_p11), %s4301_s4, 1024, %s3503_s8, [#allocation9], %s4286_s7, %s4286_s7, %s4288_s9  }
  0x50   : > { %s4302_s2 = sld [smem:[#allocation20_spill]] }
  0x56   : > { %s3212_s14 = scalar_lea.hbm %s4302_s2, 16 }
  0x57   : > { %p3213_p6 = scmp.ne.s32.totalorder %s4302_s2, %s3212_s14  ;;  %p3219_p5 = scmp.lt.u32.totalorder %s3212_s14, %s4302_s2 }
  0x59   : > { %p3215_p10 = pnand %p3213_p6, %p3515_p13 }
  0x5b   : > { %p3216_p3 = pneg %p3215_p10 }
  0x5d   : > { %p3221_p7 = pnand %p3219_p5, %p3216_p3 }
  0x5f   : > { %3224 = shalt.err (!%p3221_p7)
}
  0x60   : > { %s3225_s30 = scalar_lea.vmem %s231_s10, 16  ;;  %s3232_s8 = scalar_lea.vmem %s231_s10, 32 }
  0x61   : > { %p3226_p9 = scmp.ne.s32.totalorder %s231_s10, %s3225_s30  ;;  %p3233_p1 = scmp.lt.s32.totalorder %s231_s10, %s231_s10 }
  0x62   : > { %p3234_p2 = scmp.lt.s32.totalorder %s3232_s8, %s3225_s30 }
  0x63   : > { %p3228_p12 = pnand %p3226_p9, %p3515_p13 }
  0x64   : > { %p3235_p4 = por %p3234_p2, %p3233_p1 }
  0x65   : > { %p3229_p0 = pneg %p3228_p12 }
  0x67   : > { %p3236_p8 = pnand %p3235_p4, %p3229_p0 }
  0x69   : > { %3239 = shalt.err (!%p3236_p8)
}
  0x6a   : > { %2977 = dma.hbm_to_vmem [thread:$0]  (!%p3499_p11), %s4302_s2, 16, %s231_s10, [#allocation6]  }
  0x6b   : > { %s44_s16 = sadd.s32 1, %s3382_s20  ;;  %s37_s12 = sadd.s32 1, %s3390_s22 }
  0x6c   : > { %p51_p4 = scmp.ne.s32.totalorder %s3382_s20, %s3378_s19  ;;  %p39_p8 = scmp.ge.s32.totalorder %s37_s12, 2 }
  0x6d   : > { %p52_p13 = scmp.eq.s32.totalorder %s3394_s23, 0  ;;  %p4303_p6 = scmp.eq.s32.totalorder %s3469_s24, 1 }
  0x6e   : > { %p2995_p3 = scmp.lt.s32.totalorder %s3394_s23, 2  ;;  %s4325_s12 = smov (%p39_p8, %s37_s12), 0 }
  0x6f   : > { %p3591_p10 = por %p4303_p6, %p51_p4  ;;  %p53_p5 = por %p52_p13, %p51_p4 }
  0x70   : > { %s3599_s13 = sand.u32 1, %s3382_s20   ;;  %s41_s10 = ssub.s32 %s3390_s22, %s4325_s12 }
  0x71   : > { %p42_p11 = scmp.eq.s32.totalorder %s41_s10, 0  ;;  %s2945_s14 = smul.u32 56, %s3599_s13 }
  0x72   : > { %s2946_s15 = smul.u32 896, %s3390_s22  ;;  %p3605_p7 = pnand %p2995_p3, %p53_p5 }
  0x73   : > { %s3610_s25 = scalar_select %p42_p11, %s3382_s20, %s44_s16  }
  0x74   : > { %s4306_s0 = sld [smem:[#allocation18_spill]]  ;;  %s260_s27 = scalar_lea.vmem [#allocation2], %s2945_s14 }
  0x75   : > { %s267_s11 = sshll.u32 %s260_s27, 4  ;;  %s257_s7 = scalar_lea.sflag [#allocation3], %s3599_s13  ;;  %s3617_s11 = int_to_ptr.vmem [resolvable:$true] %s267_s11 }
  0x76   : > { %p3242_p12 = pneg %p3605_p7 }
  0x7a   : > { %s3615_s8 = scalar_lea.hbm %s4306_s0, %s2946_s15  ;;  %s3245_s29 = scalar_lea.hbm %s4306_s0, 1792 }
  0x7b   : > { %s3240_s9 = scalar_lea.hbm %s3615_s8, 896  ;;  %p3246_p2 = scmp.lt.u32.totalorder %s3615_s8, %s4306_s0 }
  0x7c   : > { %p3241_p9 = scmp.ne.s32.totalorder %s3615_s8, %s3240_s9  ;;  %p3247_p4 = scmp.lt.u32.totalorder %s3245_s29, %s3240_s9 }
  0x7d   : > { %p3249_p13 = scmp.lt.u32.totalorder %s3240_s9, %s3615_s8 }
  0x7e   : > { %p3243_p0 = pnand %p3242_p12, %p3241_p9  ;;  %p3248_p8 = por %p3247_p4, %p3246_p2 }
  0x80   : > { %p3244_p1 = pneg %p3243_p0  ;;  %p3250_p6 = por %p3249_p13, %p3248_p8 }
  0x82   : > { %p3251_p3 = pnand %p3250_p6, %p3244_p1 }
  0x84   : > { %3254 = shalt.err (!%p3251_p3)
}
  0x85   : > { %s3255_s14 = scalar_lea.vmem %s3617_s11, 896  ;;  %s3401_s27 = smov [#allocation2]  }
  0x86   : > { %p3256_p5 = scmp.ne.s32.totalorder %s3617_s11, %s3255_s14  ;;  %s3260_s16 = sshll.u32 %s3401_s27, 4  ;;  %s3261_s16 = int_to_ptr.vmem [resolvable:$false] %s3260_s16 }
  0x87   : > { %s3262_s1 = scalar_lea.vmem %s3261_s16, 1792  ;;  %p3263_p0 = scmp.lt.s32.totalorder %s3617_s11, %s3261_s16 }
  0x88   : > { %p3258_p11 = pnand %p3256_p5, %p3242_p12  ;;  %p3264_p2 = scmp.lt.s32.totalorder %s3262_s1, %s3255_s14 }
  0x8a   : > { %p3259_p9 = pneg %p3258_p11  ;;  %p3265_p4 = por %p3264_p2, %p3263_p0 }
  0x8c   : > { %p3266_p8 = pnand %p3265_p4, %p3259_p9 }
  0x8e   : > { %3269 = shalt.err (!%p3266_p8)
}
  0x8f   : > { %s4307_s9 = smov 4   ;;  %s4308_s15 = smov 64  }
  0x90   : > { %2984 = dma.hbm_to_vmem [thread:$0]  (!%p3605_p7), %s3615_s8, 896, %s3617_s11, %s257_s7, %s4308_s15, %s4308_s15, %s4307_s9  }
  0x91   : > { %s2947_s29 = smul.u32 40, %s3599_s13  ;;  %s4309_s0 = sand.u32 1, %s3394_s23  }
  0x92   : > { %s2948_s30 = smul.u32 640, %s3390_s22  ;;  %s3662_s2 = scalar_lea.sflag [#allocation9], %s4309_s0 }
  0x93   : > { %s281_s1 = scalar_lea.vmem [#allocation8], %s2947_s29  ;;  %s3275_s8 = scalar_lea.hbm %s4279_s3, 1280 }
  0x94   : > { %s3656_s16 = scalar_lea.hbm %s4279_s3, %s2948_s30  ;;  %s288_s10 = sshll.u32 %s281_s1, 4  ;;  %s3658_s10 = int_to_ptr.vmem [resolvable:$true] %s288_s10 }
  0x95   : > { %s3270_s4 = scalar_lea.hbm %s3656_s16, 640  ;;  %p3276_p3 = scmp.lt.u32.totalorder %s3656_s16, %s4279_s3 }
  0x96   : > { %p3271_p1 = scmp.ne.s32.totalorder %s3656_s16, %s3270_s4  ;;  %p3277_p5 = scmp.lt.u32.totalorder %s3275_s8, %s3270_s4 }
  0x97   : > { %p3279_p9 = scmp.lt.u32.totalorder %s3270_s4, %s3656_s16 }
  0x98   : > { %p3273_p13 = pnand %p3271_p1, %p3242_p12  ;;  %p3278_p11 = por %p3277_p5, %p3276_p3 }
  0x9a   : > { %p3274_p6 = pneg %p3273_p13  ;;  %p3280_p0 = por %p3279_p9, %p3278_p11 }
  0x9c   : > { %p3281_p2 = pnand %p3280_p0, %p3274_p6 }
  0x9e   : > { %3284 = shalt.err (!%p3281_p2)
}
  0x9f   : > { %s3285_s0 = scalar_lea.vmem %s3658_s10, 640  ;;  %s3402_s29 = smov [#allocation8]  }
  0xa0   : > { %p3286_p4 = scmp.ne.s32.totalorder %s3658_s10, %s3285_s0  ;;  %s3290_s14 = sshll.u32 %s3402_s29, 4  ;;  %s3291_s14 = int_to_ptr.vmem [resolvable:$false] %s3290_s14 }
  0xa1   : > { %s3292_s27 = scalar_lea.vmem %s3291_s14, 1280  ;;  %p3293_p13 = scmp.lt.s32.totalorder %s3658_s10, %s3291_s14 }
  0xa2   : > { %p3288_p8 = pnand %p3286_p4, %p3242_p12  ;;  %p3294_p3 = scmp.lt.s32.totalorder %s3292_s27, %s3285_s0 }
  0xa4   : > { %p3289_p1 = pneg %p3288_p8  ;;  %p3295_p5 = por %p3294_p3, %p3293_p13 }
  0xa6   : > { %p3296_p11 = pnand %p3295_p5, %p3289_p1 }
  0xa8   : > { %3299 = shalt.err (!%p3296_p11)
}
  0xa9   : > { %2987 = dma.hbm_to_vmem [thread:$0]  (!%p3605_p7), %s3656_s16, 640, %s3658_s10, %s3662_s2, %s4308_s15, %s4308_s15, %s4307_s9  }
  0xaa   : > { %p4310_p12 = scmp.ne.s32.totalorder %s4297_s28, 0 }
  0xab   : > { %s3694_s4 = sand.u32 (!%p4310_p12), 1, %s3378_s19   ;;  %p4311_p6 = scmp.ne.s32.totalorder (!%p4310_p12), %s4294_s26, 0 }
  0xac   : > { %300 = sbr.rel (%p4310_p12) target bundleno = 653 (0x28d), region = 40  ;;  %s303_s7 = scalar_lea.sflag (!%p4310_p12), [#allocation3], %s3694_s4 }
  0xad   : > { %s2949_s1 = smul.u32 (!%p4310_p12), 56, %s3694_s4 }
  0xaf   : > { %s3698_s13 = scalar_lea.vmem (!%p4310_p12), [#allocation2], %s2949_s1 }
  0xb3   : > { %3353 = dma.done.wait (%p4311_p6), %s303_s7, 896  }
  0xb4   : > { %3355 = vsyncadd (%p4311_p6), %s303_s7, 4294966400  ;;  %p4312_p7 = scmp.eq.s32.totalorder %s3469_s24, 0 }
  0xb6   : > { %3357 = dma.done.wait (%p4312_p7), [#allocation6], 9232   ;;  %p4313_p9 = pmov %p4312_p7 }
  0xb7   : > { %s319_s2 = sand.u32 1, %s3469_s24   ;;  %s2950_s28 = smul.u32 40, %s3694_s4 }
  0xb8   : > { %3359 = vsyncadd (%p4313_p9), [#allocation6], 4294958064  ;;  %s320_s17 = scalar_lea.sflag [#allocation9], %s319_s2 }
  0xb9   : > { %s3710_s10 = scalar_lea.vmem [#allocation8], %s2950_s28 }
  0xba   : > { %3361 = dma.done.wait (%p4311_p6), %s320_s17, 640  }
  0xbb   : > { %3363 = vsyncadd (%p4311_p6), %s320_s17, 4294966656  ;;  %p4314_p0 = pmov %p4312_p7 }
  0xbd   : > { %3365 = dma.done.wait (%p4314_p0), [#allocation9], 1024   ;;  %p4315_p2 = pmov %p4314_p0 }
  0xbe   : > { %v3403_v0 = vmov 0.0   ;;  %vm3404_vm0 = vmmov 0   ;;  %v3057_v1 = vld [vmem:[#allocation5 + $0x40] sm:$0xff]   ;;  %v3059_v3 = vld [vmem:[#allocation5 + $0x48] sm:$0xff]   ;;  %v3061_v5 = vld [vmem:[#allocation5 + $0x50] sm:$0xff]   ;;  %vm748_vm2 = vcmask 1046528  }
  0xbf   : > { %3367 = vsyncadd (%p4315_p2), [#allocation9], 4294966272  ;;  %2585 = vmatprep.subr.bf16.mxu0 %v3403_v0  ;;  %2621 = vmatprep.subr.bf16.mxu1 %v3403_v0  ;;  %v3058_v2 = vld [vmem:[#allocation5] sm:$0xff]   ;;  %v3060_v4 = vld [vmem:[#allocation5 + $0x8] sm:$0xff]   ;;  %vm434_vm1 = vsmask.f32 7424 }
  0xc0   : > { %2601 = vmatprep.mubr.msk.bf16.mxu0 %vm3404_vm0, %v3403_v0  ;;  %2637 = vmatprep.mubr.msk.bf16.mxu1 %vm3404_vm0, %v3403_v0  ;;  %v3062_v6 = vld [vmem:[#allocation5 + $0x10] sm:$0xff]   ;;  %v3063_v7 = vld [vmem:[#allocation5 + $0x58] sm:$0xff]   ;;  %v3065_v9 = vld [vmem:[#allocation5 + $0x60] sm:$0xff]   ;;  %vm1292_vm3 = vcmask 1045504   ;;  %vm1625_vm4 = vsmask.f32 5376 }
  0xc1   : > { %2586 = vmatpush3.bf16.msra.mxu0 %v3057_v1  ;;  %2622 = vmatpush3.bf16.msra.mxu1 %v3058_v2  ;;  %v3064_v8 = vld [vmem:[#allocation5 + $0x18] sm:$0xff]   ;;  %v3066_v10 = vld [vmem:[#allocation5 + $0x20] sm:$0xff]   ;;  %v360_v11 = vld [vmem:[%s3698_s13] sm:$0xf]  ;;  %vm1812_vm5 = vcmask 1044480   ;;  %s2951_s24 = smul.u32 80, %s3694_s4 }
  0xc2   : > { %2587 = vmatprep.subr.bf16.mxu0 %v3403_v0  ;;  %2623 = vmatprep.subr.bf16.mxu1 %v3403_v0  ;;  %v3736_v12 = vld [vmem:[%s3698_s13 + $0x4] sm:$0xf]  ;;  %v3739_v13 = vld [vmem:[%s3698_s13 + $0x8] sm:$0xf]  ;;  %v3742_v14 = vld [vmem:[%s3698_s13 + $0xc] sm:$0xf] }
  0xc3   : > { %v3745_v15 = vcombine.low %v360_v11, %v3736_v12  ;;  %v3067_v16 = vld [vmem:[#allocation5 + $0x68] sm:$0xff]   ;;  %v3749_v17 = vcombine.low %v3739_v13, %v3742_v14  ;;  %v3756_v21 = vld [vmem:[%s3698_s13 + $0x10] sm:$0xf]  ;;  %v3069_v23 = vld [vmem:[#allocation5 + $0x70] sm:$0xff]   ;;  %vm1085_vm6 = vsmask.f32 6400 }
  0xc4   : > { %v3068_v18 = vld [vmem:[#allocation5 + $0x28] sm:$0xff]   ;;  %v3761_v25 = vld [vmem:[%s3698_s13 + $0x14] sm:$0xf]  ;;  %v3070_v26 = vld [vmem:[#allocation5 + $0x30] sm:$0xff]   ;;  %s4192_s26 = scalar_lea.vmem [#allocation11], %s2951_s24  ;;  %s2952_s9 = smul.u32 1280, %s3386_s21 }
  0xc5   : > { %2588 = vmatpush3.bf16.msra.mxu0 %v3059_v3  ;;  %2624 = vmatpush3.bf16.msra.mxu1 %v3060_v4  ;;  %v438_v19 = vshll.u32 %v3745_v15, 16  ;;  %v443_v20 = vshll.u32 %v3749_v17, 16  ;;  %v447_v22 = vshrl.u32 %v3749_v17, 16  ;;  %v436_v24 = vshrl.u32 %v3745_v15, 16  ;;  %v3071_v33 = vld [vmem:[#allocation5 + $0x78] sm:$0xff]   ;;  %v3075_v40 = vld [vmem:[#allocation5 + $0x80] sm:$0xff]  }
  0xc6   : > { %2589 = vmatprep.subr.bf16.mxu0 %v3403_v0  ;;  %2625 = vmatprep.subr.bf16.mxu1 %v3403_v0  ;;  %v3767_v29 = vcombine.low %v3756_v21, %v3761_v25  ;;  %v3072_v38 = vld [vmem:[#allocation5 + $0x38] sm:$0xff]   ;;  %v3076_v41 = vld [vmem:[#allocation5 + $0xc0] sm:$0xff]   ;;  %v3077_v49 = vld [vmem:[#allocation5 + $0x88] sm:$0xff]   ;;  %s2199_s15 = sshll.u32 %s4192_s26, 4  ;;  %s4223_s11 = scalar_lea.hbm %s4281_s5, %s2952_s9  ;;  %s4225_s15 = int_to_ptr.vmem [resolvable:$true] %s2199_s15 }
  0xc7   : > { %v440_v27 = vrot.slane %v438_v19, 1  ;;  %v3763_v28 = vrot.slane %v443_v20, 3  ;;  %v3769_v30 = vrot.slane %v447_v22, 2  ;;  %v445_v36 = vrot.slane %v443_v20, 1  ;;  %v3783_v44 = vld [vmem:[%s3698_s13 + $0x18] sm:$0xf] }
  0xc8   : > { %v451_v31 = vshll.u32 %v3767_v29, 16  ;;  %v455_v34 = vshrl.u32 %v3767_v29, 16  ;;  %v3786_v45 = vld [vmem:[%s3698_s13 + $0x1c] sm:$0xf]  ;;  %v3795_v47 = vld [vmem:[%s3698_s13 + $0x28] sm:$0xf] }
  0xc9   : > { %2590 = vmatpush3.bf16.msra.mxu0 %v3061_v5  ;;  %2626 = vmatpush3.bf16.msra.mxu1 %v3062_v6  ;;  %v1628_v32 = vor.u32 %v3763_v28, %v3769_v30  ;;  %v441_v35 = vor.u32 %v440_v27, %v436_v24  ;;  %v3792_v46 = vcombine.low %v3783_v44, %v3786_v45  ;;  %v3798_v48 = vld [vmem:[%s3698_s13 + $0x2c] sm:$0xf]  ;;  %v3079_v53 = vld [vmem:[#allocation5 + $0xc8] sm:$0xff]   ;;  %v3085_v2 = vld [vmem:[#allocation5 + $0xa0] sm:$0xff]   ;;  %s2185_s21 = scalar_lea.sflag [#allocation4], %s3694_s4  ;;  %s3300_s30 = scalar_lea.vmem %s4225_s15, 1280 }
  0xca   : > { %2591 = vmatprep.subr.bf16.mxu0 %v3403_v0  ;;  %2627 = vmatprep.subr.bf16.mxu1 %v3403_v0  ;;  %v1630_v37 = vrot.slane %v451_v31, 3  ;;  %v1629_v39 = vrot.slane %v455_v34, 2  ;;  %v449_v50 = vor.u32 %v447_v22, %v445_v36  ;;  %v453_v51 = vrot.slane %v451_v31, 1  ;;  %v3080_v54 = vld [vmem:[#allocation5 + $0x90] sm:$0xff]   ;;  %v3083_v62 = vld [vmem:[#allocation5 + $0x98] sm:$0xff]   ;;  %v3086_v6 = vld [vmem:[#allocation5 + $0xe0] sm:$0xff]   ;;  %p3301_p4 = scmp.ne.s32.totalorder %s4225_s15, %s3300_s30 }
  0xcb   : > { %v446_v43 = vsel %vm434_vm1, %v441_v35, %v445_v36  ;;  %v3803_v52 = vcombine.low %v3795_v47, %v3798_v48  ;;  %v3081_v55 = vld [vmem:[#allocation5 + $0xd0] sm:$0xff]   ;;  %v459_v56 = vshll.u32 %v3792_v46, 16  ;;  %v3084_v1 = vld [vmem:[#allocation5 + $0xd8] sm:$0xff]   ;;  %v463_v4 = vshrl.u32 %v3792_v46, 16  ;;  %v3089_v11 = vld [vmem:[#allocation5 + $0xe8] sm:$0xff]   ;;  %s3405_s0 = smov [#allocation11]  }
  0xcc   : > { %v3779_v42 = vor.u32 %v1630_v37, %v1629_v39  ;;  %v454_v57 = vsel %vm434_vm1, %v449_v50, %v453_v51  ;;  %v3814_v58 = vld [vmem:[%s3698_s13 + $0x20] sm:$0xf]  ;;  %v3817_v59 = vld [vmem:[%s3698_s13 + $0x24] sm:$0xf]  ;;  %v457_v60 = vor.u32 %v455_v34, %v453_v51  ;;  %v3096_v27 = vld [vmem:[#allocation5 + $0xf8] sm:$0xff]   ;;  %v3875_v34 = vcombine.low %v3742_v14, %v3756_v21  ;;  %p3302_p8 = pnand %p3301_p4, %p3591_p10  ;;  %s3304_s29 = sshll.u32 %s3405_s0, 4  ;;  %s3305_s29 = int_to_ptr.vmem [resolvable:$false] %s3304_s29 }
  0xcd   : > { %2592 = vmatpush3.bf16.msra.mxu0 %v3063_v7  ;;  %2628 = vmatpush3.bf16.msra.mxu1 %v3064_v8  ;;  %v461_v61 = vrot.slane %v459_v56, 1  ;;  %v3826_v63 = vcombine.low %v3814_v58, %v3817_v59  ;;  %v3090_v20 = vld [vmem:[#allocation5 + $0xb0] sm:$0xff]   ;;  %v749_v35 = vrot.slane %v3745_v15, 1  ;;  %v3099_v21 = vld [vmem:[#allocation5 + $0x100] sm:$0xff]   ;;  %v1462_v39 = vrot.slane %v3767_v29, 2  ;;  %v3103_v30 = vld [vmem:[#allocation5 + $0x148] sm:$0xff]   ;;  %p3307_p13 = scmp.lt.s32.totalorder %s4225_s15, %s3305_s29 }
  0xce   : > { %2593 = vmatprep.subr.bf16.mxu0 %v3403_v0  ;;  %2629 = vmatprep.subr.bf16.mxu1 %v3403_v0  ;;  %v3094_v22 = vld [vmem:[#allocation5 + $0xf0] sm:$0xff]   ;;  %v922_v14 = vrot.slane %v3875_v34, 1  ;;  %v3100_v36 = vld [vmem:[#allocation5 + $0x140] sm:$0xff]   ;;  %v1633_v50 = vrot.slane %v463_v4, 2  ;;  %v1634_v28 = vrot.slane %v459_v56, 3  ;;  %p3303_p1 = pneg %p3302_p8  ;;  %s3306_s14 = scalar_lea.vmem %s3305_s29, 2560 }
  0xcf   : > { %v462_v3 = vsel %vm434_vm1, %v457_v60, %v461_v61  ;;  %v467_v5 = vshll.u32 %v3826_v63, 16  ;;  %v465_v7 = vor.u32 %v463_v4, %v461_v61  ;;  %v3104_v61 = vld [vmem:[#allocation5 + $0x110] sm:$0xff]   ;;  %v3940_v4 = vcombine.low %v3786_v45, %v3814_v58  ;;  %v3107_v45 = vld [vmem:[#allocation5 + $0x118] sm:$0xff]   ;;  %p3308_p3 = scmp.lt.s32.totalorder %s3306_s14, %s3300_s30 }
  0xd1   : > { %2594 = vmatpush3.bf16.msra.mxu0 %v3065_v9  ;;  %2630 = vmatpush3.bf16.msra.mxu1 %v3066_v10  ;;  %v469_v8 = vrot.slane %v467_v5, 1  ;;  %v3088_v9 = vld [vmem:[#allocation5 + $0xa8] sm:$0xff]   ;;  %v3846_v10 = vcombine.low %v3795_v47, %v3795_v47  ;;  %p3309_p5 = por %p3308_p3, %p3307_p13 }
  0xd2   : > { %2595 = vmatprep.subr.bf16.mxu0 %v3403_v0  ;;  %2631 = vmatprep.subr.bf16.mxu1 %v3403_v0 }
  0xd3   : > { %v475_v19 = vshll.u32 %v3846_v10, 16  ;;  %p3310_p11 = pnand %p3309_p5, %p3303_p1 }
  0xd5   : > { %2596 = vmatpush3.bf16.msra.mxu0 %v3067_v16  ;;  %2632 = vmatpush3.bf16.msra.mxu1 %v3068_v18  ;;  %v470_v16 = vsel %vm434_vm1, %v465_v7, %v469_v8  ;;  %v471_v18 = vshrl.u32 %v3826_v63, 16  ;;  %v477_v24 = vrot.slane %v475_v19, 1  ;;  %v1645_v7 = vshll.u32 %v3803_v52, 16 }
  0xd6   : > { %2597 = vmatprep.subr.bf16.mxu0 %v3403_v0  ;;  %2633 = vmatprep.subr.bf16.mxu1 %v3403_v0 }
  0xd7   : > { %v1647_v58 = vrot.slane %v1645_v7, 3 }
  0xd9   : > { %2598 = vmatpush3.bf16.msra.mxu0 %v3069_v23  ;;  %2634 = vmatpush3.bf16.msra.mxu1 %v3070_v26  ;;  %v473_v23 = vor.u32 %v471_v18, %v469_v8  ;;  %v3095_v26 = vld [vmem:[#allocation5 + $0xb8] sm:$0xff]   ;;  %v754_v8 = vrot.slane %v3792_v46, 1 }
  0xda   : > { %2599 = vmatprep.subr.bf16.mxu0 %v3403_v0  ;;  %2635 = vmatprep.subr.bf16.mxu1 %v3403_v0 }
  0xdb   : > { %v478_v31 = vsel %vm434_vm1, %v473_v23, %v477_v24  ;;  %v1814_v23 = vrot.slane %v3767_v29, 3 }
  0xdd   : > { %2600 = vmatpush3.bf16.msra.mxu0 %v3071_v33  ;;  %2636 = vmatpush3.bf16.msra.mxu1 %v3072_v38  ;;  %v3871_v33 = vcombine.low %v3736_v12, %v3739_v13  ;;  %v750_v12 = vrot.slane %v3749_v17, 1  ;;  %v3891_v38 = vcombine.low %v3761_v25, %v3783_v44  ;;  %v1464_v25 = vrot.slane %v3792_v46, 2 }
  0xde   : > { %2657 = vmatprep.subr.bf16.mxu0 %v3403_v0  ;;  %2693 = vmatprep.subr.bf16.mxu1 %v3403_v0  ;;  %v752_v44 = vrot.slane %v3767_v29, 1 }
  0xdf   : > { %v921_v13 = vrot.slane %v3871_v33, 1  ;;  %v751_v37 = vsel %vm748_vm2, %v749_v35, %v750_v12  ;;  %v924_v51 = vrot.slane %v3891_v38, 1  ;;  %v3974_v35 = vcombine.low %v3817_v59, %v3795_v47  ;;  %v3111_v59 = vld [vmem:[#allocation5 + $0x128] sm:$0xff]  }
  0xe0   : > { %2602 = vmatmul.mubr.bf16.vlgmr.msra.gmra.mrb[0].mxu0 %v446_v43  ;;  %2638 = vmatmul.mubr.bf16.vlgmr.msra.gmra.mrb[0].mxu1 %v3745_v15  ;;  %v1461_v15 = vrot.slane %v3749_v17, 2  ;;  %v753_v60 = vsel %vm748_vm2, %v750_v12, %v752_v44  ;;  %v755_v24 = vsel %vm748_vm2, %v752_v44, %v754_v8  ;;  %v3110_v12 = vld [vmem:[#allocation5 + $0x160] sm:$0xff]   ;;  %v1816_v47 = vrot.slane %v3792_v46, 3 }
  0xe1   : > { %2658 = vmatpush3.bf16.msra.mxu0 %v3075_v40  ;;  %2694 = vmatpush3.bf16.msra.mxu1 %v3076_v41  ;;  %v923_v40 = vsel %vm748_vm2, %v921_v13, %v922_v14  ;;  %v3101_v41 = vld [vmem:[#allocation5 + $0x108] sm:$0xff]   ;;  %v4012_v44 = vcombine.low %v3798_v48, %v3798_v48  ;;  %v1098_v48 = vshll.u32 %v3875_v34, 16  ;;  %v1104_v7 = vshrl.u32 %v3891_v38, 16 }
  0xe2   : > { %2659 = vmatprep.subr.bf16.mxu0 %v3403_v0  ;;  %2605 = vmatprep.mubr.msk.bf16.mxu0 %vm3404_vm0, %v3403_v0  ;;  %v3897_v43 = vsel %vm1292_vm3, %v1461_v15, %v1462_v39  ;;  %v1820_v15 = vrot.slane %v3803_v52, 3 }
  0xe3   : > { %2641 = vmatprep.mubr.msk.bf16.mxu1 %vm3404_vm0, %v3403_v0  ;;  %2695 = vmatprep.subr.bf16.mxu1 %v3403_v0 }
  0xe5   : > { %2660 = vmatpush3.bf16.msra.mxu0 %v3077_v49  ;;  %2696 = vmatpush3.bf16.msra.mxu1 %v3079_v53  ;;  %v3904_v49 = vsel %vm1625_vm4, %v1628_v32, %v3779_v42  ;;  %v3912_v53 = vsel %vm1292_vm3, %v1462_v39, %v1464_v25  ;;  %v1466_v32 = vrot.slane %v3826_v63, 2 }
  0xe6   : > { %2661 = vmatprep.subr.bf16.mxu0 %v3403_v0  ;;  %2697 = vmatprep.subr.bf16.mxu1 %v3403_v0 }
  0xe7   : > { %v3926_v56 = vsel %vm1292_vm3, %v1464_v25, %v1466_v32  ;;  %v3113_v25 = vld [vmem:[#allocation5 + $0x130] sm:$0xff]  }
  0xe8   : > { %2606 = vmatmul.mubr.bf16.gmra.mrb[4].mxu0 %v454_v57  ;;  %2642 = vmatmul.mubr.bf16.gmra.mrb[4].mxu1 %v3749_v17  ;;  %v1638_v57 = vrot.slane %v467_v5, 3 }
  0xe9   : > { %2662 = vmatpush3.bf16.msra.mxu0 %v3080_v54  ;;  %2698 = vmatpush3.bf16.msra.mxu1 %v3081_v55  ;;  %v1635_v54 = vor.u32 %v1634_v28, %v1633_v50  ;;  %v1637_v55 = vrot.slane %v471_v18, 2  ;;  %v3108_v18 = vld [vmem:[#allocation5 + $0x158] sm:$0xff]   ;;  %v3115_v50 = vld [vmem:[#allocation5 + $0x170] sm:$0xff]   ;;  %v1087_v28 = vshrl.u32 %v3871_v33, 16 }
  0xea   : > { %2609 = vmatprep.mubr.msk.bf16.mxu0 %vm3404_vm0, %v3403_v0  ;;  %2645 = vmatprep.mubr.msk.bf16.mxu1 %vm3404_vm0, %v3403_v0 }
  0xeb   : > { %2663 = vmatprep.subr.bf16.mxu0 %v3403_v0  ;;  %2699 = vmatprep.subr.bf16.mxu1 %v3403_v0  ;;  %v1639_v5 = vor.u32 %v1638_v57, %v1637_v55  ;;  %v3117_v55 = vld [vmem:[#allocation5 + $0x178] sm:$0xff]  }
  0xed   : > { %2664 = vmatpush3.bf16.msra.mxu0 %v3083_v62  ;;  %2700 = vmatpush3.bf16.msra.mxu1 %v3084_v1  ;;  %v3933_v62 = vsel %vm1625_vm4, %v3779_v42, %v1635_v54  ;;  %v1468_v1 = vrot.slane %v3803_v52, 2 }
  0xee   : > { %2665 = vmatprep.subr.bf16.mxu0 %v3403_v0  ;;  %2701 = vmatprep.subr.bf16.mxu1 %v3403_v0 }
  0xef   : > { %v3945_v42 = vsel %vm1292_vm3, %v1466_v32, %v1468_v1  ;;  %v1095_v32 = vshrl.u32 %v3875_v34, 16 }
  0xf0   : > { %2610 = vmatmul.mubr.bf16.gmra.mrb[8].mxu0 %v462_v3  ;;  %2646 = vmatmul.mubr.bf16.gmra.mrb[8].mxu1 %v3767_v29  ;;  %v3105_v3 = vld [vmem:[#allocation5 + $0x150] sm:$0xff]  }
  0xf1   : > { %2666 = vmatpush3.bf16.msra.mxu0 %v3085_v2  ;;  %2613 = vmatprep.mubr.msk.bf16.mxu0 %vm3404_vm0, %v3403_v0  ;;  %v925_v2 = vsel %vm748_vm2, %v922_v14, %v924_v51  ;;  %v756_v14 = vrot.slane %v3826_v63, 1 }
  0xf2   : > { %2649 = vmatprep.mubr.msk.bf16.mxu1 %vm3404_vm0, %v3403_v0  ;;  %2702 = vmatpush3.bf16.msra.mxu1 %v3086_v6  ;;  %v1642_v6 = vshrl.u32 %v3803_v52, 16 }
  0xf3   : > { %2667 = vmatprep.subr.bf16.mxu0 %v3403_v0  ;;  %2703 = vmatprep.subr.bf16.mxu1 %v3403_v0 }
  0xf5   : > { %2668 = vmatpush3.bf16.msra.mxu0 %v3088_v9  ;;  %v3950_v9 = vsel %vm1625_vm4, %v1635_v54, %v1639_v5  ;;  %v3116_v54 = vld [vmem:[#allocation5 + $0x138] sm:$0xff]  }
  0xf6   : > { %2669 = vmatprep.subr.bf16.mxu0 %v3403_v0  ;;  %2704 = vmatpush3.bf16.msra.mxu1 %v3089_v11  ;;  %v1644_v11 = vrot.slane %v1642_v6, 2 }
  0xf7   : > { %2705 = vmatprep.subr.bf16.mxu1 %v3403_v0 }
  0xf8   : > { %2614 = vmatmul.mubr.bf16.gmra.mrb[12].mxu0 %v470_v16  ;;  %2650 = vmatmul.mubr.bf16.gmra.mrb[12].mxu1 %v3792_v46  ;;  %v926_v16 = vrot.slane %v3940_v4, 1  ;;  %v3958_v19 = vor.u32 %v1647_v58, %v1644_v11  ;;  %v3112_v46 = vld [vmem:[#allocation5 + $0x168] sm:$0xff]   ;;  %v1293_v11 = vrot.slane %v3871_v33, 2 }
  0xf9   : > { %2617 = vmatprep.mubr.msk.bf16.mxu0 %vm3404_vm0, %v3403_v0  ;;  %2653 = vmatprep.mubr.msk.bf16.mxu1 %vm3404_vm0, %v3403_v0 }
  0xfa   : > { %2670 = vmatpush3.bf16.msra.mxu0 %v3090_v20  ;;  %2706 = vmatpush3.bf16.msra.mxu1 %v3094_v22  ;;  %v3961_v20 = vld [vmem:[%s3698_s13 + $0x30] ss:$0 sps:$4 sm:$0xff]   ;;  %v1813_v22 = vrot.slane %v3749_v17, 3  ;;  %v927_v17 = vsel %vm748_vm2, %v924_v51, %v926_v16  ;;  %v758_v51 = vrot.slane %v3846_v10, 1  ;;  %v930_v10 = vrot.slane %v4012_v44, 1 }
  0xfb   : > { %2671 = vmatprep.subr.bf16.mxu0 %v3403_v0  ;;  %2707 = vmatprep.subr.bf16.mxu1 %v3403_v0 }
  0xfc   : > { %v3979_v29 = vsel %vm1812_vm5, %v1813_v22, %v1814_v23  ;;  %v759_v57 = vsel %vm748_vm2, %v756_v14, %v758_v51  ;;  %v3125_v51 = vld [vmem:[#allocation5 + $0x1d8] sm:$0xff]  }
  0xfe   : > { %2672 = vmatpush3.bf16.msra.mxu0 %v3095_v26  ;;  %2708 = vmatpush3.bf16.msra.mxu1 %v3096_v27  ;;  %v3109_v26 = vld [vmem:[#allocation5 + $0x120] sm:$0xff]   ;;  %v3969_v27 = vsel %vm1625_vm4, %v1639_v5, %v3958_v19 }
  0xff   : > { %2729 = vmatprep.subr.bf16.mxu0 %v3403_v0  ;;  %2765 = vmatprep.subr.bf16.mxu1 %v3403_v0 }
 0x100   : > { %2618 = vmatmul.mubr.bf16.gmra.mrb[16].mxu0 %v478_v31  ;;  %2654 = vmatmul.mubr.bf16.gmra.mrb[16].mxu1 %v3826_v63  ;;  %v1470_v31 = vrot.slane %v3961_v20, 2 }
 0x101   : > { %2673 = vmatprep.mubr.msk.bf16.mxu0 %vm3404_vm0, %v3403_v0  ;;  %2709 = vmatprep.mubr.msk.bf16.mxu1 %vm3404_vm0, %v3403_v0 }
 0x102   : > { %v3983_v13 = vsel %vm1292_vm3, %v1468_v1, %v1470_v31  ;;  %v1097_v1 = vrot.slane %v1095_v32, 1 }
 0x108   : > { %2674 = vmatmul.mubr.bf16.vlgmr.msra.gmra.mrb[20].mxu0 %v751_v37  ;;  %2710 = vmatmul.mubr.bf16.vlgmr.msra.gmra.mrb[20].mxu1 %v923_v40  ;;  %v3994_v37 = vsel %vm1812_vm5, %v1814_v23, %v1816_v47  ;;  %v757_v40 = vsel %vm748_vm2, %v754_v8, %v756_v14  ;;  %v1107_v8 = vshll.u32 %v3891_v38, 16 }
 0x109   : > { %2730 = vmatpush3.bf16.msra.mxu0 %v3099_v21  ;;  %2766 = vmatpush3.bf16.msra.mxu1 %v3100_v36  ;;  %v1818_v21 = vrot.slane %v3826_v63, 3  ;;  %v928_v36 = vrot.slane %v3974_v35, 1 }
 0x10a   : > { %2731 = vmatprep.subr.bf16.mxu0 %v3403_v0  ;;  %2677 = vmatprep.mubr.msk.bf16.mxu0 %vm3404_vm0, %v3403_v0  ;;  %v1109_v22 = vrot.slane %v1107_v8, 2  ;;  %v3131_v8 = vld [vmem:[#allocation5 + $0x1f0] sm:$0xff]  }
 0x10b   : > { %2713 = vmatprep.mubr.msk.bf16.mxu1 %vm3404_vm0, %v3403_v0  ;;  %2767 = vmatprep.subr.bf16.mxu1 %v3403_v0  ;;  %v3999_v39 = vsel %vm1812_vm5, %v1816_v47, %v1818_v21  ;;  %v4005_v63 = vsel %vm1812_vm5, %v1818_v21, %v1820_v15  ;;  %v3122_v47 = vld [vmem:[#allocation5 + $0x190] sm:$0xff]  }
 0x10d   : > { %2732 = vmatpush3.bf16.msra.mxu0 %v3101_v41  ;;  %2768 = vmatpush3.bf16.msra.mxu1 %v3103_v30  ;;  %v929_v41 = vsel %vm748_vm2, %v926_v16, %v928_v36  ;;  %v1090_v30 = vshll.u32 %v3871_v33, 16  ;;  %v3118_v16 = vld [vmem:[#allocation5 + $0x180] sm:$0xff]   ;;  %v1296_v33 = vrot.slane %v3891_v38, 2  ;;  %v3123_v38 = vld [vmem:[#allocation5 + $0x1d0] sm:$0xff]  }
 0x10e   : > { %2733 = vmatprep.subr.bf16.mxu0 %v3403_v0  ;;  %2769 = vmatprep.subr.bf16.mxu1 %v3403_v0 }
 0x110   : > { %2678 = vmatmul.mubr.bf16.gmra.mrb[24].mxu0 %v753_v60  ;;  %2714 = vmatmul.mubr.bf16.gmra.mrb[24].mxu1 %v925_v2  ;;  %v1089_v60 = vrot.slane %v1087_v28, 1  ;;  %v1100_v2 = vrot.slane %v1098_v48, 2 }
 0x111   : > { %2734 = vmatpush3.bf16.msra.mxu0 %v3104_v61  ;;  %2770 = vmatpush3.bf16.msra.mxu1 %v3105_v3  ;;  %v1092_v61 = vrot.slane %v1090_v30, 2  ;;  %v931_v3 = vsel %vm748_vm2, %v928_v36, %v930_v10  ;;  %v3126_v30 = vld [vmem:[#allocation5 + $0x1a0] sm:$0xff]  }
 0x112   : > { %2681 = vmatprep.mubr.msk.bf16.mxu0 %vm3404_vm0, %v3403_v0  ;;  %2717 = vmatprep.mubr.msk.bf16.mxu1 %vm3404_vm0, %v3403_v0  ;;  %v1101_v6 = vor.u32 %v1100_v2, %v1097_v1  ;;  %v3129_v1 = vld [vmem:[#allocation5 + $0x1e8] sm:$0xff]  }
 0x113   : > { %2735 = vmatprep.subr.bf16.mxu0 %v3403_v0  ;;  %2771 = vmatprep.subr.bf16.mxu1 %v3403_v0  ;;  %v1093_v5 = vor.u32 %v1092_v61, %v1089_v60  ;;  %v1134_v60 = vshll.u32 %v4012_v44, 16  ;;  %v1300_v61 = vrot.slane %v3974_v35, 2 }
 0x115   : > { %2736 = vmatpush3.bf16.msra.mxu0 %v3107_v45  ;;  %2772 = vmatpush3.bf16.msra.mxu1 %v3108_v18  ;;  %v1294_v45 = vrot.slane %v3875_v34, 2  ;;  %v1102_v58 = vsel %vm1085_vm6, %v1093_v5, %v1101_v6  ;;  %v1106_v18 = vrot.slane %v1104_v7, 1  ;;  %v3121_v34 = vld [vmem:[#allocation5 + $0x1c8] sm:$0xff]   ;;  %v1136_v5 = vrot.slane %v1134_v60, 2  ;;  %v3130_v7 = vld [vmem:[#allocation5 + $0x1b0] sm:$0xff]  }
 0x116   : > { %2737 = vmatprep.subr.bf16.mxu0 %v3403_v0  ;;  %2773 = vmatprep.subr.bf16.mxu1 %v3403_v0 }
 0x117   : > { %v1295_v23 = vsel %vm1292_vm3, %v1293_v11, %v1294_v45  ;;  %v1110_v31 = vor.u32 %v1109_v22, %v1106_v18  ;;  %v1297_v36 = vsel %vm1292_vm3, %v1294_v45, %v1296_v33  ;;  %v1302_v11 = vrot.slane %v4012_v44, 2  ;;  %v3132_v45 = vld [vmem:[#allocation5 + $0x1b8] sm:$0xff]  }
 0x118   : > { %2682 = vmatmul.mubr.bf16.gmra.mrb[28].mxu0 %v755_v24  ;;  %2718 = vmatmul.mubr.bf16.gmra.mrb[28].mxu1 %v927_v17  ;;  %v3119_v24 = vld [vmem:[#allocation5 + $0x1c0] sm:$0xff]   ;;  %v1113_v17 = vshrl.u32 %v3940_v4, 16  ;;  %v3135_v22 = vld [vmem:[#allocation10] sm:$0xff]  }
 0x119   : > { %2738 = vmatpush3.bf16.msra.mxu0 %v3109_v26  ;;  %2685 = vmatprep.mubr.msk.bf16.mxu0 %vm3404_vm0, %v3403_v0  ;;  %v3120_v26 = vld [vmem:[#allocation5 + $0x188] sm:$0xff]   ;;  %v1111_v14 = vsel %vm1085_vm6, %v1101_v6, %v1110_v31  ;;  %v1303_v18 = vsel %vm1292_vm3, %v1300_v61, %v1302_v11 }
 0x11a   : > { %2721 = vmatprep.mubr.msk.bf16.mxu1 %vm3404_vm0, %v3403_v0  ;;  %2774 = vmatpush3.bf16.msra.mxu1 %v3110_v12  ;;  %v1116_v12 = vshll.u32 %v3940_v4, 16 }
 0x11b   : > { %2739 = vmatprep.subr.bf16.mxu0 %v3403_v0  ;;  %2775 = vmatprep.subr.bf16.mxu1 %v3403_v0 }
 0x11c   : > { %v1118_v21 = vrot.slane %v1116_v12, 2  ;;  %v1651_v12 = vshrl.u32 %v3961_v20, 16 }
 0x11d   : > { %2740 = vmatpush3.bf16.msra.mxu0 %v3111_v59  ;;  %v1115_v59 = vrot.slane %v1113_v17, 1  ;;  %v3142_v17 = vld [vmem:[#allocation5 + $0x220] sm:$0xff]  }
 0x11e   : > { %2741 = vmatprep.subr.bf16.mxu0 %v3403_v0  ;;  %2776 = vmatpush3.bf16.msra.mxu1 %v3112_v46 }
 0x11f   : > { %2777 = vmatprep.subr.bf16.mxu1 %v3403_v0  ;;  %v1119_v46 = vor.u32 %v1118_v21, %v1115_v59  ;;  %v3149_v21 = vld [vmem:[#allocation5 + $0x238] sm:$0xff]  }
 0x120   : > { %2686 = vmatmul.mubr.bf16.gmra.mrb[32].mxu0 %v757_v40  ;;  %2722 = vmatmul.mubr.bf16.gmra.mrb[32].mxu1 %v929_v41  ;;  %v3124_v40 = vld [vmem:[#allocation5 + $0x198] sm:$0xff]   ;;  %v1122_v41 = vshrl.u32 %v3974_v35, 16 }
 0x121   : > { %2689 = vmatprep.mubr.msk.bf16.mxu0 %vm3404_vm0, %v3403_v0  ;;  %2725 = vmatprep.mubr.msk.bf16.mxu1 %vm3404_vm0, %v3403_v0  ;;  %v1120_v28 = vsel %vm1085_vm6, %v1110_v31, %v1119_v46  ;;  %v3141_v31 = vld [vmem:[#allocation10 + $0x18] sm:$0xff]  }
 0x122   : > { %2742 = vmatpush3.bf16.msra.mxu0 %v3113_v25  ;;  %2778 = vmatpush3.bf16.msra.mxu1 %v3115_v50  ;;  %v1125_v25 = vshll.u32 %v3974_v35, 16  ;;  %v1298_v50 = vrot.slane %v3940_v4, 2  ;;  %v1124_v32 = vrot.slane %v1122_v41, 1  ;;  %v3127_v4 = vld [vmem:[#allocation5 + $0x1e0] sm:$0xff]  }
 0x123   : > { %2743 = vmatprep.subr.bf16.mxu0 %v3403_v0  ;;  %2779 = vmatprep.subr.bf16.mxu1 %v3403_v0 }
 0x124   : > { %v1127_v48 = vrot.slane %v1125_v25, 2  ;;  %v1299_v10 = vsel %vm1292_vm3, %v1296_v33, %v1298_v50  ;;  %v1301_v6 = vsel %vm1292_vm3, %v1298_v50, %v1300_v61  ;;  %v1654_v33 = vshll.u32 %v3961_v20, 16 }
 0x126   : > { %2744 = vmatpush3.bf16.msra.mxu0 %v3116_v54  ;;  %2780 = vmatpush3.bf16.msra.mxu1 %v3117_v55  ;;  %v1128_v54 = vor.u32 %v1127_v48, %v1124_v32  ;;  %v3128_v55 = vld [vmem:[#allocation5 + $0x1a8] sm:$0xff]  }
 0x127   : > { %2801 = vmatprep.subr.bf16.mxu0 %v3403_v0  ;;  %2837 = vmatprep.subr.bf16.mxu1 %v3403_v0 }
 0x128   : > { %2690 = vmatmul.mubr.bf16.gmra.mrb[36].mxu0 %v759_v57  ;;  %2726 = vmatmul.mubr.bf16.gmra.mrb[36].mxu1 %v931_v3  ;;  %v1131_v57 = vshrl.u32 %v4012_v44, 16  ;;  %v1129_v2 = vsel %vm1085_vm6, %v1119_v46, %v1128_v54  ;;  %v3134_v44 = vld [vmem:[#allocation5 + $0x200] sm:$0xff]  }
 0x129   : > { %2745 = vmatprep.mubr.msk.bf16.mxu0 %vm3404_vm0, %v3403_v0  ;;  %2781 = vmatprep.mubr.msk.bf16.mxu1 %vm3404_vm0, %v3403_v0 }
 0x12a   : > { %v1133_v3 = vrot.slane %v1131_v57, 1 }
 0x12c   : > { %v1137_v35 = vor.u32 %v1136_v5, %v1133_v3 }
 0x130   : > { %2746 = vmatmul.mubr.bf16.vlgmr.msra.gmra.mrb[40].mxu0 %v1102_v58  ;;  %2782 = vmatmul.mubr.bf16.vlgmr.msra.gmra.mrb[40].mxu1 %v1295_v23  ;;  %v3133_v58 = vld [vmem:[#allocation5 + $0x1f8] sm:$0xff]   ;;  %v3136_v23 = vld [vmem:[#allocation5 + $0x208] sm:$0xff]  }
 0x131   : > { %2802 = vmatpush3.bf16.msra.mxu0 %v3118_v16  ;;  %2838 = vmatpush3.bf16.msra.mxu1 %v3119_v24  ;;  %v1138_v16 = vsel %vm1085_vm6, %v1128_v54, %v1137_v35  ;;  %v3137_v24 = vld [vmem:[#allocation10 + $0x8] sm:$0xff]  }
 0x132   : > { %2803 = vmatprep.subr.bf16.mxu0 %v3403_v0  ;;  %2749 = vmatprep.mubr.msk.bf16.mxu0 %vm3404_vm0, %v3403_v0 }
 0x133   : > { %2785 = vmatprep.mubr.msk.bf16.mxu1 %vm3404_vm0, %v3403_v0  ;;  %2839 = vmatprep.subr.bf16.mxu1 %v3403_v0 }
 0x135   : > { %2804 = vmatpush3.bf16.msra.mxu0 %v3120_v26  ;;  %2840 = vmatpush3.bf16.msra.mxu1 %v3121_v34  ;;  %v3138_v26 = vld [vmem:[#allocation5 + $0x210] sm:$0xff]   ;;  %v3145_v34 = vld [vmem:[#allocation10 + $0x28] sm:$0xff]  }
 0x136   : > { %2805 = vmatprep.subr.bf16.mxu0 %v3403_v0  ;;  %2841 = vmatprep.subr.bf16.mxu1 %v3403_v0 }
 0x138   : > { %2750 = vmatmul.mubr.bf16.gmra.mrb[44].mxu0 %v1111_v14  ;;  %2786 = vmatmul.mubr.bf16.gmra.mrb[44].mxu1 %v1297_v36  ;;  %v1656_v14 = vrot.slane %v1654_v33, 3  ;;  %v3150_v36 = vld [vmem:[#allocation10 + $0x38] sm:$0xff]  }
 0x139   : > { %2806 = vmatpush3.bf16.msra.mxu0 %v3122_v47  ;;  %2842 = vmatpush3.bf16.msra.mxu1 %v3123_v38  ;;  %v3148_v47 = vld [vmem:[#allocation10 + $0x30] sm:$0xff]  }
 0x13a   : > { %2753 = vmatprep.mubr.msk.bf16.mxu0 %vm3404_vm0, %v3403_v0  ;;  %2789 = vmatprep.mubr.msk.bf16.mxu1 %vm3404_vm0, %v3403_v0  ;;  %v3155_v38 = vld [vmem:[%s3710_s10 + $0x20] sm:$0xff]  }
 0x13b   : > { %2807 = vmatprep.subr.bf16.mxu0 %v3403_v0  ;;  %2843 = vmatprep.subr.bf16.mxu1 %v3403_v0 }
 0x13d   : > { %2808 = vmatpush3.bf16.msra.mxu0 %v3124_v40  ;;  %2844 = vmatpush3.bf16.msra.mxu1 %v3125_v51 }
 0x13e   : > { %2809 = vmatprep.subr.bf16.mxu0 %v3403_v0  ;;  %2845 = vmatprep.subr.bf16.mxu1 %v3403_v0 }
 0x140   : > { %2754 = vmatmul.mubr.bf16.gmra.mrb[48].mxu0 %v1120_v28  ;;  %2790 = vmatmul.mubr.bf16.gmra.mrb[48].mxu1 %v1299_v10 }
 0x141   : > { %2810 = vmatpush3.bf16.msra.mxu0 %v3126_v30  ;;  %2757 = vmatprep.mubr.msk.bf16.mxu0 %vm3404_vm0, %v3403_v0 }
 0x142   : > { %2793 = vmatprep.mubr.msk.bf16.mxu1 %vm3404_vm0, %v3403_v0  ;;  %2846 = vmatpush3.bf16.msra.mxu1 %v3127_v4 }
 0x143   : > { %2811 = vmatprep.subr.bf16.mxu0 %v3403_v0  ;;  %2847 = vmatprep.subr.bf16.mxu1 %v3403_v0 }
 0x145   : > { %2812 = vmatpush3.bf16.msra.mxu0 %v3128_v55 }
 0x146   : > { %2813 = vmatprep.subr.bf16.mxu0 %v3403_v0  ;;  %2848 = vmatpush3.bf16.msra.mxu1 %v3129_v1 }
 0x147   : > { %2849 = vmatprep.subr.bf16.mxu1 %v3403_v0 }
 0x148   : > { %2758 = vmatmul.mubr.bf16.gmra.mrb[52].mxu0 %v1129_v2  ;;  %2794 = vmatmul.mubr.bf16.gmra.mrb[52].mxu1 %v1301_v6 }
 0x149   : > { %2761 = vmatprep.mubr.msk.bf16.mxu0 %vm3404_vm0, %v3403_v0  ;;  %2797 = vmatprep.mubr.msk.bf16.mxu1 %vm3404_vm0, %v3403_v0 }
 0x14a   : > { %2814 = vmatpush3.bf16.msra.mxu0 %v3130_v7  ;;  %2850 = vmatpush3.bf16.msra.mxu1 %v3131_v8 }
 0x14b   : > { %2815 = vmatprep.subr.bf16.mxu0 %v3403_v0  ;;  %2851 = vmatprep.subr.bf16.mxu1 %v3403_v0 }
 0x14e   : > { %2816 = vmatpush3.bf16.msra.mxu0 %v3132_v45  ;;  %2852 = vmatpush3.bf16.msra.mxu1 %v3133_v58 }
 0x14f   : > { %2873 = vmatprep.subr.bf16.mxu0 %v3403_v0  ;;  %2909 = vmatprep.subr.bf16.mxu1 %v3403_v0 }
 0x150   : > { %2762 = vmatmul.mubr.bf16.gmra.mrb[56].mxu0 %v1138_v16  ;;  %2798 = vmatmul.mubr.bf16.gmra.mrb[56].mxu1 %v1303_v18 }
 0x151   : > { %2817 = vmatprep.mubr.msk.bf16.mxu0 %vm3404_vm0, %v3403_v0  ;;  %2853 = vmatprep.mubr.msk.bf16.mxu1 %vm3404_vm0, %v3403_v0 }
 0x158   : > { %2818 = vmatmul.mubr.bf16.vlgmr.msra.gmra.mrb[60].mxu0 %v3897_v43  ;;  %2854 = vmatmul.mubr.bf16.vlgmr.msra.gmra.mrb[60].mxu1 %v3904_v49  ;;  %v3139_v43 = vld [vmem:[#allocation10 + $0x10] sm:$0xff]   ;;  %v3140_v49 = vld [vmem:[#allocation5 + $0x218] sm:$0xff]  }
 0x159   : > { %2874 = vmatpush3.bf16.msra.mxu0 %v3134_v44  ;;  %2910 = vmatpush3.bf16.msra.mxu1 %v3135_v22 }
 0x15a   : > { %2875 = vmatprep.subr.bf16.mxu0 %v3403_v0  ;;  %2821 = vmatprep.mubr.msk.bf16.mxu0 %vm3404_vm0, %v3403_v0 }
 0x15b   : > { %2857 = vmatprep.mubr.msk.bf16.mxu1 %vm3404_vm0, %v3403_v0  ;;  %2911 = vmatprep.subr.bf16.mxu1 %v3403_v0 }
 0x15d   : > { %2876 = vmatpush3.bf16.msra.mxu0 %v3136_v23  ;;  %2912 = vmatpush3.bf16.msra.mxu1 %v3137_v24 }
 0x15e   : > { %2877 = vmatprep.subr.bf16.mxu0 %v3403_v0  ;;  %2913 = vmatprep.subr.bf16.mxu1 %v3403_v0 }
 0x160   : > { %2822 = vmatmul.mubr.bf16.gmra.mrb[64].mxu0 %v3912_v53  ;;  %2858 = vmatmul.mubr.bf16.gmra.mrb[64].mxu1 %v3933_v62  ;;  %v3143_v53 = vld [vmem:[#allocation10 + $0x20] sm:$0xff]   ;;  %v3144_v62 = vld [vmem:[#allocation5 + $0x228] sm:$0xff]  }
 0x161   : > { %2878 = vmatpush3.bf16.msra.mxu0 %v3138_v26  ;;  %2914 = vmatpush3.bf16.msra.mxu1 %v3139_v43 }
 0x162   : > { %2825 = vmatprep.mubr.msk.bf16.mxu0 %vm3404_vm0, %v3403_v0  ;;  %2861 = vmatprep.mubr.msk.bf16.mxu1 %vm3404_vm0, %v3403_v0 }
 0x163   : > { %2879 = vmatprep.subr.bf16.mxu0 %v3403_v0  ;;  %2915 = vmatprep.subr.bf16.mxu1 %v3403_v0 }
 0x165   : > { %2880 = vmatpush3.bf16.msra.mxu0 %v3140_v49  ;;  %2916 = vmatpush3.bf16.msra.mxu1 %v3141_v31 }
 0x166   : > { %2881 = vmatprep.subr.bf16.mxu0 %v3403_v0  ;;  %2917 = vmatprep.subr.bf16.mxu1 %v3403_v0 }
 0x168   : > { %2826 = vmatmul.mubr.bf16.gmra.mrb[68].mxu0 %v3926_v56  ;;  %2862 = vmatmul.mubr.bf16.gmra.mrb[68].mxu1 %v3950_v9  ;;  %v3146_v56 = vld [vmem:[#allocation5 + $0x230] sm:$0xff]   ;;  %v1653_v9 = vrot.slane %v1651_v12, 2 }
 0x169   : > { %2882 = vmatpush3.bf16.msra.mxu0 %v3142_v17  ;;  %2829 = vmatprep.mubr.msk.bf16.mxu0 %vm3404_vm0, %v3403_v0 }
 0x16a   : > { %2865 = vmatprep.mubr.msk.bf16.mxu1 %vm3404_vm0, %v3403_v0  ;;  %2918 = vmatpush3.bf16.msra.mxu1 %v3143_v53  ;;  %v1657_v59 = vor.u32 %v1656_v14, %v1653_v9 }
 0x16b   : > { %2883 = vmatprep.subr.bf16.mxu0 %v3403_v0  ;;  %2919 = vmatprep.subr.bf16.mxu1 %v3403_v0 }
 0x16d   : > { %2884 = vmatpush3.bf16.msra.mxu0 %v3144_v62 }
 0x16e   : > { %2885 = vmatprep.subr.bf16.mxu0 %v3403_v0  ;;  %2920 = vmatpush3.bf16.msra.mxu1 %v3145_v34 }
 0x16f   : > { %2921 = vmatprep.subr.bf16.mxu1 %v3403_v0 }
 0x170   : > { %2830 = vmatmul.mubr.bf16.gmra.mrb[72].mxu0 %v3945_v42  ;;  %2866 = vmatmul.mubr.bf16.gmra.mrb[72].mxu1 %v3969_v27  ;;  %v1658_v42 = vsel %vm1625_vm4, %v3958_v19, %v1657_v59  ;;  %v3151_v27 = vld [vmem:[%s3710_s10] sm:$0xff]   ;;  %v3152_v19 = vld [vmem:[%s3710_s10 + $0x8] sm:$0xff]  }
 0x171   : > { %2833 = vmatprep.mubr.msk.bf16.mxu0 %vm3404_vm0, %v3403_v0  ;;  %2869 = vmatprep.mubr.msk.bf16.mxu1 %vm3404_vm0, %v3403_v0 }
 0x172   : > { %2886 = vmatpush3.bf16.msra.mxu0 %v3146_v56  ;;  %2922 = vmatpush3.bf16.msra.mxu1 %v3148_v47 }
 0x173   : > { %2887 = vmatprep.subr.bf16.mxu0 %v3403_v0  ;;  %2923 = vmatprep.subr.bf16.mxu1 %v3403_v0 }
 0x176   : > { %2888 = vmatpush3.bf16.msra.mxu0 %v3149_v21  ;;  %2924 = vmatpush3.bf16.msra.mxu1 %v3150_v36 }
 0x178   : > { %2834 = vmatmul.mubr.bf16.gmra.mrb[76].mxu0 %v3983_v13  ;;  %2870 = vmatmul.mubr.bf16.gmra.mrb[76].mxu1 %v1658_v42  ;;  %v3153_v13 = vld [vmem:[%s3710_s10 + $0x10] sm:$0xff]  }
 0x179   : > { %2889 = vmatprep.mubr.msk.bf16.mxu0 %vm3404_vm0, %v3403_v0  ;;  %2925 = vmatprep.mubr.msk.bf16.mxu1 %vm3404_vm0, %v3403_v0 }
 0x180   : > { %2890 = vmatmul.mubr.bf16.vlgmr.msra.gmra.mrb[80].mxu0 %v3979_v29  ;;  %2926 = vmatmul.mubr.bf16.vlgmr.msra.gmra.mrb[80].mxu1 %v3151_v27  ;;  %v3154_v29 = vld [vmem:[%s3710_s10 + $0x18] sm:$0xff]  }
 0x181   : > { %2893 = vmatprep.mubr.msk.bf16.mxu0 %vm3404_vm0, %v3403_v0  ;;  %2929 = vmatprep.mubr.msk.bf16.mxu1 %vm3404_vm0, %v3403_v0 }
 0x188   : > { %2894 = vmatmul.mubr.bf16.gmra.mrb[84].mxu0 %v3994_v37  ;;  %2930 = vmatmul.mubr.bf16.gmra.mrb[84].mxu1 %v3152_v19  ;;  %v1822_v37 = vrot.slane %v3961_v20, 3 }
 0x189   : > { %2897 = vmatprep.mubr.msk.bf16.mxu0 %vm3404_vm0, %v3403_v0  ;;  %2933 = vmatprep.mubr.msk.bf16.mxu1 %vm3404_vm0, %v3403_v0 }
 0x190   : > { %2898 = vmatmul.mubr.bf16.gmra.mrb[88].mxu0 %v3999_v39  ;;  %2934 = vmatmul.mubr.bf16.gmra.mrb[88].mxu1 %v3153_v13  ;;  %v1823_v39 = vsel %vm1812_vm5, %v1820_v15, %v1822_v37 }
 0x191   : > { %2901 = vmatprep.mubr.msk.bf16.mxu0 %vm3404_vm0, %v3403_v0  ;;  %2937 = vmatprep.mubr.msk.bf16.mxu1 %vm3404_vm0, %v3403_v0 }
 0x198   : > { %2902 = vmatmul.mubr.bf16.gmra.mrb[92].mxu0 %v4005_v63  ;;  %2938 = vmatmul.mubr.bf16.gmra.mrb[92].mxu1 %v3154_v29 }
 0x199   : > { %2905 = vmatprep.mubr.msk.bf16.mxu0 %vm3404_vm0, %v3403_v0  ;;  %2941 = vmatprep.mubr.msk.bf16.mxu1 %vm3404_vm0, %v3403_v0 }
 0x1a0   : > { %2906 = vmatmul.mubr.bf16.gmra.mrb[96].mxu0 %v1823_v39  ;;  %2942 = vmatmul.mubr.bf16.gmra.mrb[96].mxu1 %v3155_v38 }
 0x1b3   : > { %v566_v46 = vpop.f32.mrb[0].mxu0  ;;  %v692_v40 = vpop.f32.mrb[0].mxu1 }
 0x1b4   : > { %v2603_v41 = vpop.f32.mrb[1].mxu0  ;;  %v693_v63 = vadd.f32 %v692_v40, %v566_v46  ;;  %v2639_v25 = vpop.f32.mrb[1].mxu1 }
 0x1b5   : > { %v569_v50 = vpop.f32.mrb[2].mxu0  ;;  %v695_v51 = vpop.f32.mrb[2].mxu1 }
 0x1b6   : > { %v2604_v28 = vpop.f32.mrb[3].mxu0  ;;  %v696_v30 = vadd.f32 %v695_v51, %v569_v50  ;;  %v2640_v20 = vpop.f32.mrb[3].mxu1 }
 0x1bb   : > { %v574_v32 = vpop.f32.mrb[4].mxu0  ;;  %v700_v48 = vpop.f32.mrb[4].mxu1 }
 0x1bc   : > { %v2607_v0 = vpop.f32.mrb[5].mxu0  ;;  %v701_v10 = vadd.f32 %v700_v48, %v574_v32  ;;  %v2643_v52 = vpop.f32.mrb[5].mxu1 }
 0x1bd   : > { %v577_v4 = vpop.f32.mrb[6].mxu0  ;;  %v703_v15 = vpop.f32.mrb[6].mxu1 }
 0x1be   : > { %v2608_v54 = vpop.f32.mrb[7].mxu0  ;;  %v704_v55 = vadd.f32 %v703_v15, %v577_v4  ;;  %v2644_v57 = vpop.f32.mrb[7].mxu1 }
 0x1c3   : > { %v582_v60 = vpop.f32.mrb[8].mxu0  ;;  %v708_v61 = vpop.f32.mrb[8].mxu1 }
 0x1c4   : > { %v2611_v1 = vpop.f32.mrb[9].mxu0  ;;  %v709_v2 = vadd.f32 %v708_v61, %v582_v60  ;;  %v2647_v3 = vpop.f32.mrb[9].mxu1 }
 0x1c5   : > { %v585_v5 = vpop.f32.mrb[10].mxu0  ;;  %v711_v6 = vpop.f32.mrb[10].mxu1 }
 0x1c6   : > { %v2612_v7 = vpop.f32.mrb[11].mxu0  ;;  %v712_v8 = vadd.f32 %v711_v6, %v585_v5  ;;  %v2648_v35 = vpop.f32.mrb[11].mxu1 }
 0x1cb   : > { %v590_v11 = vpop.f32.mrb[12].mxu0  ;;  %v716_v45 = vpop.f32.mrb[12].mxu1 }
 0x1cc   : > { %v2615_v58 = vpop.f32.mrb[13].mxu0  ;;  %v717_v16 = vadd.f32 %v716_v45, %v590_v11  ;;  %v2651_v18 = vpop.f32.mrb[13].mxu1 }
 0x1cd   : > { %v593_v44 = vpop.f32.mrb[14].mxu0  ;;  %v719_v22 = vpop.f32.mrb[14].mxu1 }
 0x1ce   : > { %v2616_v23 = vpop.f32.mrb[15].mxu0  ;;  %v720_v24 = vadd.f32 %v719_v22, %v593_v44  ;;  %v2652_v26 = vpop.f32.mrb[15].mxu1 }
 0x1d3   : > { %v598_v43 = vpop.f32.mrb[16].mxu0  ;;  %v724_v49 = vpop.f32.mrb[16].mxu1 }
 0x1d4   : > { %v2619_v31 = vpop.f32.mrb[17].mxu0  ;;  %v725_v17 = vadd.f32 %v724_v49, %v598_v43  ;;  %v2655_v53 = vpop.f32.mrb[17].mxu1 }
 0x1d5   : > { %v601_v62 = vpop.f32.mrb[18].mxu0  ;;  %v727_v12 = vpop.f32.mrb[18].mxu1 }
 0x1d6   : > { %v2620_v33 = vpop.f32.mrb[19].mxu0  ;;  %v728_v34 = vadd.f32 %v727_v12, %v601_v62  ;;  %v2656_v56 = vpop.f32.mrb[19].mxu1 }
 0x1db   : > { %v847_v9 = vpop.f32.mrb[20].mxu0  ;;  %v1019_v47 = vpop.f32.mrb[20].mxu1 }
 0x1dc   : > { %v886_v14 = vadd.f32 %v847_v9, %v693_v63  ;;  %v2675_v59 = vpop.f32.mrb[21].mxu0  ;;  %v2711_v21 = vpop.f32.mrb[21].mxu1 }
 0x1dd   : > { %v850_v36 = vpop.f32.mrb[22].mxu0  ;;  %v1022_v19 = vpop.f32.mrb[22].mxu1 }
 0x1de   : > { %v1058_v42 = vadd.f32 %v1019_v47, %v886_v14  ;;  %v887_v27 = vadd.f32 %v850_v36, %v696_v30  ;;  %v2676_v13 = vpop.f32.mrb[23].mxu0  ;;  %v2712_v29 = vpop.f32.mrb[23].mxu1 }
 0x1e0   : > { %v1059_v37 = vadd.f32 %v1022_v19, %v887_v27 }
 0x1e3   : > { %v855_v39 = vpop.f32.mrb[24].mxu0  ;;  %v1027_v46 = vpop.f32.mrb[24].mxu1 }
 0x1e4   : > { %v888_v38 = vadd.f32 %v855_v39, %v701_v10  ;;  %v2679_v40 = vpop.f32.mrb[25].mxu0  ;;  %v2715_v41 = vpop.f32.mrb[25].mxu1 }
 0x1e5   : > { %v858_v25 = vpop.f32.mrb[26].mxu0  ;;  %v1030_v28 = vpop.f32.mrb[26].mxu1 }
 0x1e6   : > { %v1060_v50 = vadd.f32 %v1027_v46, %v888_v38  ;;  %v889_v51 = vadd.f32 %v858_v25, %v704_v55  ;;  %v2680_v63 = vpop.f32.mrb[27].mxu0  ;;  %v2716_v20 = vpop.f32.mrb[27].mxu1 }
 0x1e8   : > { %v1061_v32 = vadd.f32 %v1030_v28, %v889_v51 }
 0x1eb   : > { %v863_v48 = vpop.f32.mrb[28].mxu0  ;;  %v1035_v52 = vpop.f32.mrb[28].mxu1 }
 0x1ec   : > { %v890_v0 = vadd.f32 %v863_v48, %v709_v2  ;;  %v2683_v30 = vpop.f32.mrb[29].mxu0  ;;  %v2719_v4 = vpop.f32.mrb[29].mxu1 }
 0x1ed   : > { %v866_v15 = vpop.f32.mrb[30].mxu0  ;;  %v1038_v60 = vpop.f32.mrb[30].mxu1 }
 0x1ee   : > { %v1062_v54 = vadd.f32 %v1035_v52, %v890_v0  ;;  %v891_v57 = vadd.f32 %v866_v15, %v712_v8  ;;  %v2684_v10 = vpop.f32.mrb[31].mxu0  ;;  %v2720_v61 = vpop.f32.mrb[31].mxu1 }
 0x1f0   : > { %v1063_v1 = vadd.f32 %v1038_v60, %v891_v57 }
 0x1f3   : > { %v871_v3 = vpop.f32.mrb[32].mxu0  ;;  %v1043_v6 = vpop.f32.mrb[32].mxu1 }
 0x1f4   : > { %v892_v5 = vadd.f32 %v871_v3, %v717_v16  ;;  %v2687_v55 = vpop.f32.mrb[33].mxu0  ;;  %v2723_v7 = vpop.f32.mrb[33].mxu1 }
 0x1f5   : > { %v874_v35 = vpop.f32.mrb[34].mxu0  ;;  %v1046_v58 = vpop.f32.mrb[34].mxu1 }
 0x1f6   : > { %v1064_v11 = vadd.f32 %v1043_v6, %v892_v5  ;;  %v893_v45 = vadd.f32 %v874_v35, %v720_v24  ;;  %v2688_v2 = vpop.f32.mrb[35].mxu0  ;;  %v2724_v18 = vpop.f32.mrb[35].mxu1 }
 0x1f8   : > { %v1065_v44 = vadd.f32 %v1046_v58, %v893_v45 }
 0x1fb   : > { %v879_v22 = vpop.f32.mrb[36].mxu0  ;;  %v1051_v26 = vpop.f32.mrb[36].mxu1 }
 0x1fc   : > { %v894_v23 = vadd.f32 %v879_v22, %v725_v17  ;;  %v2691_v8 = vpop.f32.mrb[37].mxu0  ;;  %v2727_v43 = vpop.f32.mrb[37].mxu1 }
 0x1fd   : > { %v882_v49 = vpop.f32.mrb[38].mxu0  ;;  %v1054_v62 = vpop.f32.mrb[38].mxu1 }
 0x1fe   : > { %v1066_v31 = vadd.f32 %v1051_v26, %v894_v23  ;;  %v895_v53 = vadd.f32 %v882_v49, %v728_v34  ;;  %v2692_v16 = vpop.f32.mrb[39].mxu0  ;;  %v2728_v12 = vpop.f32.mrb[39].mxu1 }
 0x200   : > { %v1067_v33 = vadd.f32 %v1054_v62, %v895_v53 }
 0x203   : > { %v1226_v56 = vpop.f32.mrb[40].mxu0  ;;  %v1391_v14 = vpop.f32.mrb[40].mxu1 }
 0x204   : > { %v1265_v9 = vadd.f32 %v1226_v56, %v1058_v42  ;;  %v2747_v24 = vpop.f32.mrb[41].mxu0  ;;  %v2783_v47 = vpop.f32.mrb[41].mxu1 }
 0x205   : > { %v1229_v59 = vpop.f32.mrb[42].mxu0  ;;  %v1394_v27 = vpop.f32.mrb[42].mxu1 }
 0x206   : > { %v1430_v21 = vadd.f32 %v1391_v14, %v1265_v9  ;;  %v1266_v36 = vadd.f32 %v1229_v59, %v1059_v37  ;;  %v2748_v17 = vpop.f32.mrb[43].mxu0  ;;  %v2784_v19 = vpop.f32.mrb[43].mxu1 }
 0x208   : > { %v1431_v13 = vadd.f32 %v1394_v27, %v1266_v36 }
 0x20b   : > { %v1234_v29 = vpop.f32.mrb[44].mxu0  ;;  %v1399_v38 = vpop.f32.mrb[44].mxu1 }
 0x20c   : > { %v1267_v39 = vadd.f32 %v1234_v29, %v1060_v50  ;;  %v2751_v34 = vpop.f32.mrb[45].mxu0  ;;  %v2787_v46 = vpop.f32.mrb[45].mxu1 }
 0x20d   : > { %v1237_v40 = vpop.f32.mrb[46].mxu0  ;;  %v1402_v51 = vpop.f32.mrb[46].mxu1 }
 0x20e   : > { %v1432_v41 = vadd.f32 %v1399_v38, %v1267_v39  ;;  %v1268_v25 = vadd.f32 %v1237_v40, %v1061_v32  ;;  %v2752_v42 = vpop.f32.mrb[47].mxu0  ;;  %v2788_v28 = vpop.f32.mrb[47].mxu1 }
 0x210   : > { %v1433_v63 = vadd.f32 %v1402_v51, %v1268_v25 }
 0x213   : > { %v1242_v20 = vpop.f32.mrb[48].mxu0  ;;  %v1407_v0 = vpop.f32.mrb[48].mxu1 }
 0x214   : > { %v1269_v48 = vadd.f32 %v1242_v20, %v1062_v54  ;;  %v2755_v37 = vpop.f32.mrb[49].mxu0  ;;  %v2791_v52 = vpop.f32.mrb[49].mxu1 }
 0x215   : > { %v1245_v30 = vpop.f32.mrb[50].mxu0  ;;  %v1410_v57 = vpop.f32.mrb[50].mxu1 }
 0x216   : > { %v1434_v4 = vadd.f32 %v1407_v0, %v1269_v48  ;;  %v1270_v15 = vadd.f32 %v1245_v30, %v1063_v1  ;;  %v2756_v50 = vpop.f32.mrb[51].mxu0  ;;  %v2792_v60 = vpop.f32.mrb[51].mxu1 }
 0x218   : > { %v1435_v10 = vadd.f32 %v1410_v57, %v1270_v15 }
 0x21b   : > { %v1250_v61 = vpop.f32.mrb[52].mxu0  ;;  %v1415_v5 = vpop.f32.mrb[52].mxu1 }
 0x21c   : > { %v1271_v3 = vadd.f32 %v1250_v61, %v1064_v11  ;;  %v2759_v32 = vpop.f32.mrb[53].mxu0  ;;  %v2795_v6 = vpop.f32.mrb[53].mxu1 }
 0x21d   : > { %v1253_v55 = vpop.f32.mrb[54].mxu0  ;;  %v1418_v45 = vpop.f32.mrb[54].mxu1 }
 0x21e   : > { %v1436_v7 = vadd.f32 %v1415_v5, %v1271_v3  ;;  %v1272_v35 = vadd.f32 %v1253_v55, %v1065_v44  ;;  %v2760_v54 = vpop.f32.mrb[55].mxu0  ;;  %v2796_v58 = vpop.f32.mrb[55].mxu1 }
 0x220   : > { %v1437_v2 = vadd.f32 %v1418_v45, %v1272_v35 }
 0x223   : > { %v1258_v18 = vpop.f32.mrb[56].mxu0  ;;  %v1423_v23 = vpop.f32.mrb[56].mxu1 }
 0x224   : > { %v1273_v22 = vadd.f32 %v1258_v18, %v1066_v31  ;;  %v2763_v1 = vpop.f32.mrb[57].mxu0  ;;  %v2799_v26 = vpop.f32.mrb[57].mxu1 }
 0x225   : > { %v1261_v8 = vpop.f32.mrb[58].mxu0  ;;  %v1426_v53 = vpop.f32.mrb[58].mxu1 }
 0x226   : > { %v1438_v43 = vadd.f32 %v1423_v23, %v1273_v22  ;;  %v1274_v49 = vadd.f32 %v1261_v8, %v1067_v33  ;;  %v2764_v11 = vpop.f32.mrb[59].mxu0  ;;  %v2800_v62 = vpop.f32.mrb[59].mxu1 }
 0x228   : > { %v1439_v16 = vadd.f32 %v1426_v53, %v1274_v49 }
 0x22b   : > { %v1559_v12 = vpop.f32.mrb[60].mxu0  ;;  %v1746_v9 = vpop.f32.mrb[60].mxu1 }
 0x22c   : > { %v1598_v56 = vadd.f32 %v1559_v12, %v1430_v21  ;;  %v2819_v44 = vpop.f32.mrb[61].mxu0  ;;  %v2855_v14 = vpop.f32.mrb[61].mxu1 }
 0x22d   : > { %v1562_v24 = vpop.f32.mrb[62].mxu0  ;;  %v1749_v36 = vpop.f32.mrb[62].mxu1 }
 0x22e   : > { %v1785_v47 = vadd.f32 %v1746_v9, %v1598_v56  ;;  %v1599_v59 = vadd.f32 %v1562_v24, %v1431_v13  ;;  %v2820_v31 = vpop.f32.mrb[63].mxu0  ;;  %v2856_v27 = vpop.f32.mrb[63].mxu1  ;;  %v4188_v9 = vld [vmem:[#allocation7] ss:$0 sm:$0xff] }
 0x230   : > { %v1786_v17 = vadd.f32 %v1749_v36, %v1599_v59 }
 0x233   : > { %v1567_v19 = vpop.f32.mrb[64].mxu0  ;;  %v1754_v39 = vpop.f32.mrb[64].mxu1 }
 0x234   : > { %v1600_v29 = vadd.f32 %v1567_v19, %v1432_v41  ;;  %v2823_v33 = vpop.f32.mrb[65].mxu0  ;;  %v2859_v38 = vpop.f32.mrb[65].mxu1 }
 0x235   : > { %v1570_v34 = vpop.f32.mrb[66].mxu0  ;;  %v1757_v21 = vpop.f32.mrb[66].mxu1 }
 0x236   : > { %v4171_v46 = vadd.f32 %v1754_v39, %v1600_v29  ;;  %v1601_v40 = vadd.f32 %v1570_v34, %v1433_v63  ;;  %v2824_v25 = vpop.f32.mrb[67].mxu0  ;;  %v2860_v51 = vpop.f32.mrb[67].mxu1 }
 0x238   : > { %v4173_v42 = vadd.f32 %v1757_v21, %v1601_v40 }
 0x23b   : > { %v1575_v28 = vpop.f32.mrb[68].mxu0  ;;  %v1762_v20 = vpop.f32.mrb[68].mxu1 }
 0x23c   : > { %v1602_v13 = vadd.f32 %v1575_v28, %v1434_v4  ;;  %v2827_v48 = vpop.f32.mrb[69].mxu0  ;;  %v2863_v0 = vpop.f32.mrb[69].mxu1 }
 0x23d   : > { %v1578_v37 = vpop.f32.mrb[70].mxu0  ;;  %v1765_v30 = vpop.f32.mrb[70].mxu1 }
 0x23e   : > { %v4175_v52 = vadd.f32 %v1762_v20, %v1602_v13  ;;  %v1603_v41 = vadd.f32 %v1578_v37, %v1435_v10  ;;  %v2828_v15 = vpop.f32.mrb[71].mxu0  ;;  %v2864_v57 = vpop.f32.mrb[71].mxu1 }
 0x240   : > { %v4177_v50 = vadd.f32 %v1765_v30, %v1603_v41 }
 0x243   : > { %v1583_v63 = vpop.f32.mrb[72].mxu0  ;;  %v1770_v61 = vpop.f32.mrb[72].mxu1 }
 0x244   : > { %v1604_v60 = vadd.f32 %v1583_v63, %v1436_v7  ;;  %v2831_v3 = vpop.f32.mrb[73].mxu0  ;;  %v2867_v5 = vpop.f32.mrb[73].mxu1 }
 0x245   : > { %v1586_v32 = vpop.f32.mrb[74].mxu0  ;;  %v1773_v55 = vpop.f32.mrb[74].mxu1 }
 0x246   : > { %v4179_v6 = vadd.f32 %v1770_v61, %v1604_v60  ;;  %v1605_v4 = vadd.f32 %v1586_v32, %v1437_v2  ;;  %v2832_v35 = vpop.f32.mrb[75].mxu0  ;;  %v2868_v45 = vpop.f32.mrb[75].mxu1 }
 0x248   : > { %v4181_v54 = vadd.f32 %v1773_v55, %v1605_v4 }
 0x24b   : > { %v1591_v10 = vpop.f32.mrb[76].mxu0  ;;  %v1778_v18 = vpop.f32.mrb[76].mxu1 }
 0x24c   : > { %v1606_v58 = vadd.f32 %v1591_v10, %v1438_v43  ;;  %v2835_v22 = vpop.f32.mrb[77].mxu0  ;;  %v2871_v23 = vpop.f32.mrb[77].mxu1 }
 0x24d   : > { %v1594_v1 = vpop.f32.mrb[78].mxu0  ;;  %v1781_v8 = vpop.f32.mrb[78].mxu1 }
 0x24e   : > { %v4183_v7 = vadd.f32 %v1778_v18, %v1606_v58  ;;  %v1607_v26 = vadd.f32 %v1594_v1, %v1439_v16  ;;  %v2836_v49 = vpop.f32.mrb[79].mxu0  ;;  %v2872_v53 = vpop.f32.mrb[79].mxu1 }
 0x250   : > { %v4185_v11 = vadd.f32 %v1781_v8, %v1607_v26 }
 0x253   : > { %v1911_v2 = vpop.f32.mrb[80].mxu0  ;;  %v2098_v12 = vpop.f32.mrb[80].mxu1 }
 0x254   : > { %v1950_v62 = vadd.f32 %v1911_v2, %v1785_v47  ;;  %v2891_v56 = vpop.f32.mrb[81].mxu0  ;;  %v2927_v43 = vpop.f32.mrb[81].mxu1 }
 0x255   : > { %v1914_v44 = vpop.f32.mrb[82].mxu0  ;;  %v2101_v59 = vpop.f32.mrb[82].mxu1 }
 0x256   : > { %v2137_v14 = vadd.f32 %v2098_v12, %v1950_v62  ;;  %v1951_v24 = vadd.f32 %v1914_v44, %v1786_v17  ;;  %v2892_v36 = vpop.f32.mrb[83].mxu0  ;;  %v2928_v31 = vpop.f32.mrb[83].mxu1 }
 0x258   : > { %v2154_v16 = vadd.f32 %v4188_v9, %v2137_v14  ;;  %v2138_v27 = vadd.f32 %v2101_v59, %v1951_v24 }
 0x25a   : > { %v2164_v19 = vmax.f32 %v2154_v16, 0.0  ;;  %v2155_v29 = vadd.f32 %v4188_v9, %v2138_v27 }
 0x25b   : > { %v1919_v39 = vpop.f32.mrb[84].mxu0  ;;  %v2106_v17 = vpop.f32.mrb[84].mxu1 }
 0x25c   : > { %2174 = vst [vmem:[%s4192_s26] sm:$0xff] %v2164_v19  ;;  %v2165_v47 = vmax.f32 %v2155_v29, 0.0  ;;  %v1952_v33 = vadd.f32 %v1919_v39, %v4171_v46  ;;  %v2895_v38 = vpop.f32.mrb[85].mxu0  ;;  %v2931_v34 = vpop.f32.mrb[85].mxu1 }
 0x25d   : > { %v1922_v40 = vpop.f32.mrb[86].mxu0  ;;  %v2109_v51 = vpop.f32.mrb[86].mxu1 }
 0x25e   : > { %2175 = vst [vmem:[%s4192_s26 + $0x8] sm:$0xff] %v2165_v47  ;;  %v2139_v21 = vadd.f32 %v2106_v17, %v1952_v33  ;;  %v1953_v25 = vadd.f32 %v1922_v40, %v4173_v42  ;;  %v2896_v28 = vpop.f32.mrb[87].mxu0  ;;  %v2932_v13 = vpop.f32.mrb[87].mxu1 }
 0x260   : > { %v2156_v20 = vadd.f32 %v4188_v9, %v2139_v21  ;;  %v2140_v48 = vadd.f32 %v2109_v51, %v1953_v25 }
 0x262   : > { %v2166_v0 = vmax.f32 %v2156_v20, 0.0  ;;  %v2157_v37 = vadd.f32 %v4188_v9, %v2140_v48 }
 0x263   : > { %v1927_v46 = vpop.f32.mrb[88].mxu0  ;;  %v2114_v15 = vpop.f32.mrb[88].mxu1 }
 0x264   : > { %2176 = vst [vmem:[%s4192_s26 + $0x10] sm:$0xff] %v2166_v0  ;;  %v2167_v41 = vmax.f32 %v2157_v37, 0.0  ;;  %v1954_v30 = vadd.f32 %v1927_v46, %v4175_v52  ;;  %v2899_v57 = vpop.f32.mrb[89].mxu0  ;;  %v2935_v63 = vpop.f32.mrb[89].mxu1 }
 0x265   : > { %v1930_v42 = vpop.f32.mrb[90].mxu0  ;;  %v2117_v3 = vpop.f32.mrb[90].mxu1 }
 0x266   : > { %2177 = vst [vmem:[%s4192_s26 + $0x18] sm:$0xff] %v2167_v41  ;;  %v2141_v60 = vadd.f32 %v2114_v15, %v1954_v30  ;;  %v1955_v61 = vadd.f32 %v1930_v42, %v4177_v50  ;;  %v2900_v5 = vpop.f32.mrb[91].mxu0  ;;  %v2936_v32 = vpop.f32.mrb[91].mxu1 }
 0x268   : > { %v2158_v4 = vadd.f32 %v4188_v9, %v2141_v60  ;;  %v2142_v55 = vadd.f32 %v2117_v3, %v1955_v61 }
 0x26a   : > { %v2168_v35 = vmax.f32 %v2158_v4, 0.0  ;;  %v2159_v45 = vadd.f32 %v4188_v9, %v2142_v55 }
 0x26b   : > { %v1935_v52 = vpop.f32.mrb[92].mxu0  ;;  %v2122_v18 = vpop.f32.mrb[92].mxu1 }
 0x26c   : > { %2178 = vst [vmem:[%s4192_s26 + $0x20] sm:$0xff] %v2168_v35  ;;  %v2169_v10 = vmax.f32 %v2159_v45, 0.0  ;;  %v1956_v58 = vadd.f32 %v1935_v52, %v4179_v6  ;;  %v2903_v22 = vpop.f32.mrb[93].mxu0  ;;  %v2939_v23 = vpop.f32.mrb[93].mxu1 }
 0x26d   : > { %v1938_v50 = vpop.f32.mrb[94].mxu0  ;;  %v2125_v8 = vpop.f32.mrb[94].mxu1 }
 0x26e   : > { %2179 = vst [vmem:[%s4192_s26 + $0x28] sm:$0xff] %v2169_v10  ;;  %v2143_v1 = vadd.f32 %v2122_v18, %v1956_v58  ;;  %v1957_v26 = vadd.f32 %v1938_v50, %v4181_v54  ;;  %v2904_v49 = vpop.f32.mrb[95].mxu0  ;;  %v2940_v53 = vpop.f32.mrb[95].mxu1 }
 0x270   : > { %v2160_v2 = vadd.f32 %v4188_v9, %v2143_v1  ;;  %v2144_v62 = vadd.f32 %v2125_v8, %v1957_v26 }
 0x272   : > { %v2170_v12 = vmax.f32 %v2160_v2, 0.0  ;;  %v2161_v6 = vadd.f32 %v4188_v9, %v2144_v62 }
 0x273   : > { %v1943_v56 = vpop.f32.mrb[96].mxu0  ;;  %v2130_v14 = vpop.f32.mrb[96].mxu1 }
 0x274   : > { %2180 = vst [vmem:[%s4192_s26 + $0x30] sm:$0xff] %v2170_v12  ;;  %v2171_v43 = vmax.f32 %v2161_v6, 0.0  ;;  %v1958_v44 = vadd.f32 %v1943_v56, %v4183_v7  ;;  %v2907_v24 = vpop.f32.mrb[97].mxu0  ;;  %v2943_v54 = vpop.f32.mrb[97].mxu1 }
 0x275   : > { %v1946_v59 = vpop.f32.mrb[98].mxu0  ;;  %v2133_v16 = vpop.f32.mrb[98].mxu1 }
 0x276   : > { %2181 = vst [vmem:[%s4192_s26 + $0x38] sm:$0xff] %v2171_v43  ;;  %v2145_v36 = vadd.f32 %v2130_v14, %v1958_v44  ;;  %v1959_v31 = vadd.f32 %v1946_v59, %v4185_v11  ;;  %v2908_v27 = vpop.f32.mrb[99].mxu0  ;;  %v2944_v19 = vpop.f32.mrb[99].mxu1 }
 0x278   : > { %v2162_v29 = vadd.f32 %v4188_v9, %v2145_v36  ;;  %v2146_v39 = vadd.f32 %v2133_v16, %v1959_v31 }
 0x27a   : > { %v2172_v7 = vmax.f32 %v2162_v29, 0.0  ;;  %v2163_v47 = vadd.f32 %v4188_v9, %v2146_v39 }
 0x27c   : > { %2182 = vst [vmem:[%s4192_s26 + $0x40] sm:$0xff] %v2172_v7  ;;  %v2173_v11 = vmax.f32 %v2163_v47, 0.0 }
 0x27e   : > { %2183 = vst [vmem:[%s4192_s26 + $0x48] sm:$0xff] %v2173_v11 }
 0x27f   : > { %3313 = shalt.err (!%p3310_p11)
}
 0x280   : > { %s3314_s27 = scalar_lea.hbm %s4223_s11, 1280  ;;  %s3318_s13 = scalar_lea.hbm %s4281_s5, 2560 }
 0x281   : > { %p3315_p12 = scmp.ne.s32.totalorder %s4223_s11, %s3314_s27  ;;  %p3319_p9 = scmp.lt.u32.totalorder %s4223_s11, %s4281_s5 }
 0x282   : > { %p3320_p0 = scmp.lt.u32.totalorder %s3318_s13, %s3314_s27  ;;  %p3322_p4 = scmp.lt.u32.totalorder %s3314_s27, %s4223_s11 }
 0x283   : > { %p3316_p6 = pnand %p3315_p12, %p3591_p10 }
 0x284   : > { %p3321_p2 = por %p3320_p0, %p3319_p9 }
 0x285   : > { %p3317_p7 = pneg %p3316_p6 }
 0x286   : > { %p3323_p8 = por %p3322_p4, %p3321_p2 }
 0x288   : > { %p3324_p1 = pnand %p3323_p8, %p3317_p7 }
 0x28a   : > { %3327 = shalt.err (!%p3324_p1)
}
 0x28b   : > { %s3406_s17 = smov 128   ;;  %s3407_s10 = smov 8  }
 0x28c   : > { %2969 = dma.vmem_to_hbm [thread:$0]  (%p3591_p10), %s4225_s15, 1280, %s4223_s11, %s2185_s21, %s3406_s17, %s3406_s17, %s3407_s10  }
 0x28d PF: > { %s4316_s24 = sld [smem:[#allocation17_spill]]  ;;  %s2214_s26 = sand.u32 1, %s3374_s18  }
 0x28e   : > { %p4318_p3 = scmp.ge.s32.totalorder %s3394_s23, 2  ;;  %s2215_s9 = scalar_lea.sflag [#allocation4], %s2214_s26 }
 0x293   : > { %p4317_p13 = scmp.ne.s32.totalorder %s4316_s24, 0 }
 0x295   : > { %p2989_p5 = pnand %p4318_p3, %p4317_p13 }
 0x297   : > { %3369 = dma.done.wait (!%p2989_p5), %s2215_s9, 1280  }
 0x298   : > { %3371 = vsyncadd (!%p2989_p5), %s2215_s9, 4294966016  ;;  %s25_s23 = sadd.s32 1, %s3394_s23   ;;  %s4319_s18 = smov %s3378_s19 }
 0x299   : > { %p22_p11 = scmp.ge.s32.totalorder %s25_s23, 4   ;;  %s4320_s19 = smov %s3382_s20 }
 0x29a   : > { %s4321_s20 = smov %s3610_s25  ;;  %s4322_s21 = smov %s3390_s22 }
 0x29b   : > { %s4323_s22 = smov %s4325_s12  ;;  %24 = sbr.rel (!%p22_p11) target bundleno = 14 (0xe), region = 121 }
 0x2a2   :  { %2220 = vsyncpa [#allocation3], 1 }
 0x2a3   :  { %2222 = vsyncpa [#allocation3 + $0x1], 1 }
 0x2a4   :  { %2223 = vsyncpa [#allocation6], 1 }
 0x2a5   :  { %2224 = vsyncpa [#allocation9], 1 }
 0x2a6   :  { %2226 = vsyncpa [#allocation9 + $0x1], 1 }
 0x2a7   :  { %2227 = vsyncpa [#allocation4], 1 }
 0x2a8   :  { %2229 = vsyncpa [#allocation4 + $0x1], 1 }

</bundles_post_ra>
